<compile_context>
chip_gen: v7x
topology: tpu7x:2x2x1
jax: 0.10.0
libtpu: 0.0.40
codegen_flags: <defaults>
</compile_context>

<pallas_src>
import functools

import jax
import jax.numpy as jnp
from jax.experimental import pallas as pl
from jax.experimental.pallas import tpu as pltpu


def _round_up(x, m):
    return (x + m - 1) // m * m


def _cdiv(a, b):
    return (a + b - 1) // b


@functools.lru_cache(maxsize=None)
def _tpu_config():
    """(tensorcores_per_chip, vmem_limit_bytes), generation aware."""
    kind = ""
    try:
        kind = (jax.devices()[0].device_kind or "").lower()
    except Exception:
        pass
    if "v7" in kind:                         # 64 MiB physical VMEM, 2 TCs
        return 2, 48 * 1024 * 1024
    if "v5" in kind or "v6" in kind:         # 128 MiB physical VMEM
        cores = 2 if "v5p" in kind else 1
        return cores, 96 * 1024 * 1024
    return 2, 32 * 1024 * 1024               # unknown: conservative budget


# ---------------------------------------------------------------------------
# Pallas kernel
# ---------------------------------------------------------------------------
def _conv_kernel(*refs, apply_act, with_stats, slope, m_real, tile_m):
    """One M-tile of  out[C_out, Mt] = W[C_out, K] @ act(P[K, Mt]) + bias.

    act(p) = LeakyReLU(p * a_row + s_row): the previous layer's BN affine +
    LeakyReLU fused into the patch load (apply_act), otherwise identity.
    Optionally emits per-tile BN partial stats (sum, sum-of-squares) of the
    pre-BN output, with padded M columns masked out.
    """
    w_ref, b_ref = refs[0], refs[1]
    if apply_act:
        a_ref, s_ref, p_ref = refs[2], refs[3], refs[4]
        out_refs = refs[5:]
    else:
        p_ref = refs[2]
        out_refs = refs[3:]
    o_ref = out_refs[0]

    p = p_ref[...]
    if apply_act:
        q = p.astype(jnp.float32) * a_ref[...] + s_ref[...]
        q = jnp.maximum(q, slope * q)            # LeakyReLU, single VPU max
        p = q.astype(jnp.bfloat16)

    acc = jnp.dot(w_ref[...], p, preferred_element_type=jnp.float32)
    acc = acc + b_ref[...]

    if with_stats:
        st_ref = out_refs[1]
        c_out = acc.shape[0]
        col = pl.program_id(0) * tile_m + jax.lax.broadcasted_iota(
            jnp.int32, acc.shape, 1)
        av = jnp.where(col < m_real, acc, 0.0)   # exclude padded M columns
        psum = jnp.sum(av, axis=1, keepdims=True)        # (C_out, 1)
        psq = jnp.sum(av * av, axis=1, keepdims=True)    # (C_out, 1)
        sel = jax.lax.broadcasted_iota(jnp.int32, (c_out, 2), 1)
        st_ref[0] = jnp.where(sel == 0, psum, psq)       # (C_out, 2)

    o_ref[...] = acc.astype(o_ref.dtype)


# ---------------------------------------------------------------------------
# im2col in channel-major layout (plain JAX, static 4x4 unroll)
# ---------------------------------------------------------------------------
def _pad_cm(x_cm, pad, pad_val=None):
    """Spatial padding of (C, N, H, W) with zeros or a per-channel constant."""
    if pad == 0:
        return x_cm
    if pad_val is None:
        return jnp.pad(x_cm, ((0, 0), (0, 0), (pad, pad), (pad, pad)))
    c, n, h, w = x_cm.shape
    base = jnp.broadcast_to(
        pad_val.astype(x_cm.dtype).reshape(c, 1, 1, 1),
        (c, n, h + 2 * pad, w + 2 * pad))
    return jax.lax.dynamic_update_slice(base, x_cm, (0, 0, pad, pad))


def _im2col_cm(xp, kh, kw, stride):
    """(C, N, Hp, Wp) -> [C*kh*kw, N*Ho*Wo]; rows (c, i, j), cols (n, ho, wo)."""
    c, n, hp, wp = xp.shape
    ho = (hp - kh) // stride + 1
    wo = (wp - kw) // stride + 1
    cols = [xp[:, :, i:i + stride * ho:stride, j:j + stride * wo:stride]
            for i in range(kh) for j in range(kw)]
    pat = jnp.stack(cols, axis=1)                      # (C, kh*kw, N, Ho, Wo)
    return pat.reshape(c * kh * kw, n * ho * wo), ho, wo


# ---------------------------------------------------------------------------
# Pallas wrapper: one conv layer
# ---------------------------------------------------------------------------
def conv2d_pallas(x_cm, w, b, *, stride, pad, in_affine=None, with_stats,
                  slope=0.2, tile_m=2048):
    """Conv2d as an im2col matmul with lane-dense channel-major output.

    in_affine: optional (scale, shift) per input channel.  When given, the
    previous layer's BN affine + LeakyReLU is applied to the loaded patch tile
    inside the kernel; conv zero-padding is emulated with per-channel pad
    values that map to 0 through that activation.
    Returns (out2d [C_out, Mp] pre-activation, stats or None, (M, Mt, Ho, Wo)).
    """
    n_cores, vmem_limit = _tpu_config()
    c_out, c_in, kh, kw = w.shape
    apply_act = in_affine is not None

    if apply_act:
        scale = in_affine[0].astype(jnp.float32)
        shift = in_affine[1].astype(jnp.float32)
        safe = jnp.where(scale == 0, 1.0, scale)
        pad_val = jnp.where(scale == 0, 0.0, -shift / safe)   # lrelu(a*v+s) == 0
    else:
        pad_val = None

    # bf16 activation into im2col halves the patch materialization traffic.
    xp = _pad_cm(x_cm.astype(jnp.bfloat16), pad, pad_val)
    patches, ho, wo = _im2col_cm(xp, kh, kw, stride)          # [K, M] bf16
    K, M = patches.shape

    Kp = _round_up(K, 16)               # bf16 sublane multiple; no 128 over-pad
    m128 = _round_up(M, 128)
    Mt = min(_round_up(tile_m, 128), m128)
    if n_cores > 1 and M > 128:
        # keep >= n_cores tiles so the "parallel" axis uses every TensorCore
        Mt = min(Mt, _round_up(_cdiv(M, n_cores), 128))
    Mt = max(Mt, 128)
    Mp = _round_up(M, Mt)
    n_tiles = Mp // Mt

    patches = jnp.pad(patches, ((0, Kp - K), (0, Mp - M)))
    w2d = jnp.pad(w.reshape(c_out, K), ((0, 0), (0, Kp - K))).astype(jnp.bfloat16)
    b2d = b.reshape(c_out, 1).astype(jnp.float32)

    # bf16 inter-layer activations; f32 fallback when C_out is not a bf16
    # sublane multiple (layer 1 at small dim) to keep layouts trivially legal.
    out_dtype = jnp.bfloat16 if c_out % 16 == 0 else jnp.float32

    in_specs = [pl.BlockSpec((c_out, Kp), lambda i: (0, 0)),   # weights resident
                pl.BlockSpec((c_out, 1), lambda i: (0, 0))]    # bias resident
    inputs = [w2d, b2d]
    if apply_act:
        a_rows = jnp.pad(jnp.repeat(scale, kh * kw), (0, Kp - K),
                         constant_values=1.0).reshape(Kp, 1)
        s_rows = jnp.pad(jnp.repeat(shift, kh * kw), (0, Kp - K)).reshape(Kp, 1)
        in_specs += [pl.BlockSpec((Kp, 1), lambda i: (0, 0)),
                     pl.BlockSpec((Kp, 1), lambda i: (0, 0))]
        inputs += [a_rows, s_rows]
    in_specs.append(pl.BlockSpec((Kp, Mt), lambda i: (0, i)))  # pipelined tile
    inputs.append(patches)

    cost = pl.CostEstimate(
        flops=2 * c_out * Kp * Mp, transcendentals=0,
        bytes_accessed=(c_out * Kp * 2 + Kp * Mp * 2
                        + c_out * Mp * jnp.dtype(out_dtype).itemsize))
    cparams = pltpu.CompilerParams(
        dimension_semantics=("parallel",),       # megacore sharding when >1 TC
        vmem_limit_bytes=vmem_limit)
    kern = functools.partial(_conv_kernel, apply_act=apply_act,
                             with_stats=with_stats, slope=slope,
                             m_real=M, tile_m=Mt)

    if with_stats:
        out2d, stats = pl.pallas_call(
            kern, grid=(n_tiles,), in_specs=in_specs,
            out_specs=(pl.BlockSpec((c_out, Mt), lambda i: (0, i)),
                       pl.BlockSpec((1, c_out, 2), lambda i: (i, 0, 0))),
            out_shape=(jax.ShapeDtypeStruct((c_out, Mp), out_dtype),
                       jax.ShapeDtypeStruct((n_tiles, c_out, 2), jnp.float32)),
            compiler_params=cparams, cost_estimate=cost,
        )(*inputs)
    else:
        out2d = pl.pallas_call(
            kern, grid=(n_tiles,), in_specs=in_specs,
            out_specs=pl.BlockSpec((c_out, Mt), lambda i: (0, i)),
            out_shape=jax.ShapeDtypeStruct((c_out, Mp), out_dtype),
            compiler_params=cparams, cost_estimate=cost,
        )(*inputs)
        stats = None
    return out2d, stats, (M, Mt, ho, wo)


def _bn_affine(stats, m, gamma, beta, eps=1e-5):
    """Training-mode BatchNorm2d affine (biased variance) from partial sums."""
    s = jnp.sum(stats, axis=0)                       # (C, 2)
    mean = s[:, 0] / m
    var = jnp.maximum(s[:, 1] / m - mean * mean, 0.0)
    scale = gamma.astype(jnp.float32) * jax.lax.rsqrt(var + eps)
    shift = beta.astype(jnp.float32) - mean * scale
    return scale, shift


# ---------------------------------------------------------------------------
# Parameters and forward pass
# ---------------------------------------------------------------------------
def init_params(key, in_ch, dim):
    ks = jax.random.split(key, 8)

    def cw(k, co, ci, kh=4, kw=4):
        return 0.05 * jax.random.normal(k, (co, ci, kh, kw), jnp.float32)

    def cb(k, co):
        return 0.01 * jax.random.normal(k, (co,), jnp.float32)

    return {
        "w1": cw(ks[0], dim, in_ch),        "b1": cb(ks[1], dim),
        "w2": cw(ks[2], 2 * dim, dim),      "b2": cb(ks[3], 2 * dim),
        "g2": jnp.ones((2 * dim,), jnp.float32),
        "be2": jnp.zeros((2 * dim,), jnp.float32),
        "w3": cw(ks[4], 4 * dim, 2 * dim),  "b3": cb(ks[5], 4 * dim),
        "g3": jnp.ones((4 * dim,), jnp.float32),
        "be3": jnp.zeros((4 * dim,), jnp.float32),
        "w4": cw(ks[6], 1, 4 * dim),        "b4": cb(ks[7], 1),
    }


def modified_discriminator_forward(params, x_nchw):
    n = x_nchw.shape[0]
    # One cheap layout change at the boundary: NCHW -> (C, N, H, W).
    x_cm = jnp.transpose(x_nchw, (1, 0, 2, 3)).astype(jnp.float32)

    # Conv1 (k4 s2 p1).  Its LeakyReLU is fused into conv2's patch load, so
    # the kernel writes the pre-activation output only.
    y1, _, (m1, _, h1, w1) = conv2d_pallas(
        x_cm, params["w1"], params["b1"], stride=2, pad=1,
        in_affine=None, with_stats=False)
    a1 = y1[:, :m1].reshape(params["w1"].shape[0], n, h1, w1)

    dim1 = params["w1"].shape[0]
    ident = (jnp.ones((dim1,), jnp.float32), jnp.zeros((dim1,), jnp.float32))

    # Conv2 (k4 s2 p1): fused LeakyReLU(conv1) on patches + conv + BN2 stats.
    y2, st2, (m2, _, h2, w2) = conv2d_pallas(
        a1, params["w2"], params["b2"], stride=2, pad=1,
        in_affine=ident, with_stats=True)
    sc2, sh2 = _bn_affine(st2, m2, params["g2"], params["be2"])
    a2 = y2[:, :m2].reshape(params["w2"].shape[0], n, h2, w2)

    # Conv3 (k4 s2 p1): fused BN2 affine + LeakyReLU on patches + BN3 stats.
    y3, st3, (m3, _, h3, w3) = conv2d_pallas(
        a2, params["w3"], params["b3"], stride=2, pad=1,
        in_affine=(sc2, sh2), with_stats=True)
    sc3, sh3 = _bn_affine(st3, m3, params["g3"], params["be3"])
    a3 = y3[:, :m3].reshape(params["w3"].shape[0], n, h3, w3)

    # Conv4 (k4 s1 p0, C_out=1): M = batch, pure launch overhead as a
    # pallas_call, so BN3 affine + LeakyReLU + the tiny valid conv stay in XLA.
    x4 = (a3.astype(jnp.float32) * sc3.reshape(-1, 1, 1, 1)
          + sh3.reshape(-1, 1, 1, 1))
    x4 = jnp.maximum(x4, 0.2 * x4)
    c_out, c_in, kh, kw = params["w4"].shape
    p4, _, _ = _im2col_cm(x4, kh, kw, 1)
    out = jnp.dot(params["w4"].reshape(c_out, c_in * kh * kw), p4,
                  preferred_element_type=jnp.float32) + params["b4"].reshape(c_out, 1)
    # .view(-1, 1).squeeze(1)
    return out.reshape(-1)


if __name__ == "__main__":
    # img_size = (32, 32, 3), dim = 8, batch = 2 (input must reach 4x4 before
    # the final 4x4 valid conv, as in the DCGAN-style discriminator).
    key = jax.random.PRNGKey(0)
    k_x, k_p = jax.random.split(key)
    batch, in_ch, img_hw, dim = 2, 3, 32, 8
    x = jax.random.normal(k_x, (batch, in_ch, img_hw, img_hw), jnp.float32)  # NCHW
    params = init_params(k_p, in_ch, dim)

    out = jax.jit(modified_discriminator_forward)(params, x)
    out = jax.block_until_ready(out)
    assert out.shape == (batch,), out.shape
    assert bool(jnp.all(jnp.isfinite(out)))
    print("KERNEL_OK")
</pallas_src>

<mosaic_0001>
module attributes {stable_mosaic.version = 11 : i64} {
  func.func @_conv_kernel(%arg0: i32, %arg1: memref<8x48xbf16, #tpu.memory_space<vmem>>, %arg2: memref<8x1xf32, #tpu.memory_space<vmem>>, %arg3: memref<48x256xbf16, #tpu.memory_space<vmem>>, %arg4: memref<8x256xf32, #tpu.memory_space<vmem>>) attributes {dimension_semantics = [#tpu.dimension_semantics<parallel>], iteration_bounds = array<i64: 2>, scalar_prefetch = 0 : i64, scratch_operands = 0 : i64, tpu.core_type = #tpu.core_type<tc>, window_params = [{pipeline_mode = #tpu.pipeline_mode<synchronous>, transform_indices = @transform_0, window_bounds = array<i64: 8, 48>}, {pipeline_mode = #tpu.pipeline_mode<synchronous>, transform_indices = @transform_1, window_bounds = array<i64: 8, 1>}, {transform_indices = @transform_2, window_bounds = array<i64: 48, 256>}, {transform_indices = @transform_3, window_bounds = array<i64: 8, 256>}]} {
    %c0 = arith.constant 0 : index
    %c0_0 = arith.constant 0 : index
    %0 = vector.load %arg3[%c0, %c0_0] : memref<48x256xbf16, #tpu.memory_space<vmem>>, vector<48x256xbf16>
    %c0_1 = arith.constant 0 : index
    %c0_2 = arith.constant 0 : index
    %1 = vector.load %arg1[%c0_1, %c0_2] : memref<8x48xbf16, #tpu.memory_space<vmem>>, vector<8x48xbf16>
    %cst = arith.constant dense<0.000000e+00> : vector<8x256xf32>
    %2 = tpu.matmul %1, %0, %cst {dimension_numbers = #tpu.dot_dimension_numbers<[1], [0], [0], [1], [0, 0, 1, 1], [], []>} : vector<8x48xbf16>, vector<48x256xbf16>, vector<8x256xf32> -> vector<8x256xf32>
    %c0_3 = arith.constant 0 : index
    %c0_4 = arith.constant 0 : index
    %3 = vector.load %arg2[%c0_3, %c0_4] : memref<8x1xf32, #tpu.memory_space<vmem>>, vector<8x1xf32>
    %4 = vector.broadcast %3 : vector<8x1xf32> to vector<8x256xf32>
    %5 = arith.addf %2, %4 : vector<8x256xf32>
    %c0_5 = arith.constant 0 : index
    %c0_6 = arith.constant 0 : index
    %6 = vector.load %arg4[%c0_5, %c0_6] : memref<8x256xf32, #tpu.memory_space<vmem>>, vector<8x256xf32>
    tpu.vector_store %arg4[%c0_5, %c0_6], %5 {strides = array<i32>} : memref<8x256xf32, #tpu.memory_space<vmem>>, vector<8x256xf32>,
    return
  }
  func.func @transform_0(%arg0: i32) -> (i32, i32) {
    %c0_i32 = arith.constant 0 : i32
    %c0_i32_0 = arith.constant 0 : i32
    %c0_i32_1 = arith.constant 0 : i32
    return %c0_i32, %c0_i32_0 : i32, i32
  }
  func.func @transform_1(%arg0: i32) -> (i32, i32) {
    %c0_i32 = arith.constant 0 : i32
    %c0_i32_0 = arith.constant 0 : i32
    %c0_i32_1 = arith.constant 0 : i32
    return %c0_i32, %c0_i32_0 : i32, i32
  }
  func.func @transform_2(%arg0: i32) -> (i32, i32) {
    %c0_i32 = arith.constant 0 : i32
    %c0_i32_0 = arith.constant 0 : i32
    return %c0_i32, %arg0 : i32, i32
  }
  func.func @transform_3(%arg0: i32) -> (i32, i32) {
    %c0_i32 = arith.constant 0 : i32
    %c0_i32_0 = arith.constant 0 : i32
    return %c0_i32, %arg0 : i32, i32
  }
}

module attributes {stable_mosaic.version = 11 : i64} {
  func.func @_conv_kernel(%arg0: i32, %arg1: memref<16x128xbf16, #tpu.memory_space<vmem>>, %arg2: memref<16x1xf32, #tpu.memory_space<vmem>>, %arg3: memref<128x1xf32, #tpu.memory_space<vmem>>, %arg4: memref<128x1xf32, #tpu.memory_space<vmem>>, %arg5: memref<128x128xbf16, #tpu.memory_space<vmem>>, %arg6: memref<16x128xbf16, #tpu.memory_space<vmem>>, %arg7: memref<1x16x2xf32, #tpu.memory_space<vmem>>) attributes {dimension_semantics = [#tpu.dimension_semantics<parallel>], iteration_bounds = array<i64: 1>, scalar_prefetch = 0 : i64, scratch_operands = 0 : i64, tpu.core_type = #tpu.core_type<tc>, window_params = [{pipeline_mode = #tpu.pipeline_mode<synchronous>, transform_indices = @transform_0, window_bounds = array<i64: 16, 128>}, {pipeline_mode = #tpu.pipeline_mode<synchronous>, transform_indices = @transform_1, window_bounds = array<i64: 16, 1>}, {pipeline_mode = #tpu.pipeline_mode<synchronous>, transform_indices = @transform_2, window_bounds = array<i64: 128, 1>}, {pipeline_mode = #tpu.pipeline_mode<synchronous>, transform_indices = @transform_3, window_bounds = array<i64: 128, 1>}, {transform_indices = @transform_4, window_bounds = array<i64: 128, 128>}, {transform_indices = @transform_5, window_bounds = array<i64: 16, 128>}, {transform_indices = @transform_6, window_bounds = array<i64: 1, 16, 2>}]} {
    %c0 = arith.constant 0 : index
    %c0_0 = arith.constant 0 : index
    %0 = vector.load %arg5[%c0, %c0_0] : memref<128x128xbf16, #tpu.memory_space<vmem>>, vector<128x128xbf16>
    %1 = arith.extf %0 : vector<128x128xbf16> to vector<128x128xf32>
    %c0_1 = arith.constant 0 : index
    %c0_2 = arith.constant 0 : index
    %2 = vector.load %arg3[%c0_1, %c0_2] : memref<128x1xf32, #tpu.memory_space<vmem>>, vector<128x1xf32>
    %3 = vector.broadcast %2 : vector<128x1xf32> to vector<128x128xf32>
    %4 = arith.mulf %1, %3 : vector<128x128xf32>
    %c0_3 = arith.constant 0 : index
    %c0_4 = arith.constant 0 : index
    %5 = vector.load %arg4[%c0_3, %c0_4] : memref<128x1xf32, #tpu.memory_space<vmem>>, vector<128x1xf32>
    %6 = vector.broadcast %5 : vector<128x1xf32> to vector<128x128xf32>
    %7 = arith.addf %4, %6 : vector<128x128xf32>
    %cst = arith.constant 2.000000e-01 : f32
    %8 = vector.broadcast %cst : f32 to vector<128x128xf32>
    %9 = arith.mulf %8, %7 : vector<128x128xf32>
    %10 = arith.maximumf %7, %9 : vector<128x128xf32>
    %11 = arith.truncf %10 : vector<128x128xf32> to vector<128x128xbf16>
    %c0_5 = arith.constant 0 : index
    %c0_6 = arith.constant 0 : index
    %12 = vector.load %arg1[%c0_5, %c0_6] : memref<16x128xbf16, #tpu.memory_space<vmem>>, vector<16x128xbf16>
    %cst_7 = arith.constant dense<0.000000e+00> : vector<16x128xf32>
    %13 = tpu.matmul %12, %11, %cst_7 {dimension_numbers = #tpu.dot_dimension_numbers<[1], [0], [0], [1], [0, 0, 1, 1], [], []>} : vector<16x128xbf16>, vector<128x128xbf16>, vector<16x128xf32> -> vector<16x128xf32>
    %c0_8 = arith.constant 0 : index
    %c0_9 = arith.constant 0 : index
    %14 = vector.load %arg2[%c0_8, %c0_9] : memref<16x1xf32, #tpu.memory_space<vmem>>, vector<16x1xf32>
    %15 = vector.broadcast %14 : vector<16x1xf32> to vector<16x128xf32>
    %16 = arith.addf %13, %15 : vector<16x128xf32>
    %c128_i32 = arith.constant 128 : i32
    %17 = arith.muli %arg0, %c128_i32 : i32
    %18 = tpu.iota {dimensions = array<i32: 1>} : vector<16x128xi32>
    %19 = vector.broadcast %17 : i32 to vector<16x128xi32>
    %20 = arith.addi %19, %18 : vector<16x128xi32>
    %c128_i32_10 = arith.constant 128 : i32
    %21 = vector.broadcast %c128_i32_10 : i32 to vector<16x128xi32>
    %22 = arith.cmpi slt, %20, %21 : vector<16x128xi32>
    %cst_11 = arith.constant 0.000000e+00 : f32
    %23 = vector.broadcast %cst_11 : f32 to vector<16x128xf32>
    %24 = arith.select %22, %16, %23 : vector<16x128xi1>, vector<16x128xf32>
    %cst_12 = arith.constant dense<0.000000e+00> : vector<16xf32>
    %25 = vector.multi_reduction <add>, %24, %cst_12 [1] : vector<16x128xf32> to vector<16xf32>
    %26 = vector.shape_cast %25 : vector<16xf32> to vector<16x1xf32>
    %27 = arith.mulf %24, %24 : vector<16x128xf32>
    %cst_13 = arith.constant dense<0.000000e+00> : vector<16xf32>
    %28 = vector.multi_reduction <add>, %27, %cst_13 [1] : vector<16x128xf32> to vector<16xf32>
    %29 = vector.shape_cast %28 : vector<16xf32> to vector<16x1xf32>
    %30 = tpu.iota {dimensions = array<i32: 1>} : vector<16x2xi32>
    %c0_i32 = arith.constant 0 : i32
    %31 = vector.broadcast %c0_i32 : i32 to vector<16x2xi32>
    %32 = arith.cmpi eq, %30, %31 : vector<16x2xi32>
    %33 = vector.shape_cast %26 : vector<16x1xf32> to vector<16x1xf32>
    %34 = vector.broadcast %33 : vector<16x1xf32> to vector<16x2xf32>
    %35 = vector.shape_cast %29 : vector<16x1xf32> to vector<16x1xf32>
    %36 = vector.broadcast %35 : vector<16x1xf32> to vector<16x2xf32>
    %37 = arith.select %32, %34, %36 : vector<16x2xi1>, vector<16x2xf32>
    %c0_14 = arith.constant 0 : index
    %c0_15 = arith.constant 0 : index
    %c0_16 = arith.constant 0 : index
    %38 = vector.load %arg7[%c0_14, %c0_15, %c0_16] : memref<1x16x2xf32, #tpu.memory_space<vmem>>, vector<1x16x2xf32>
    %39 = vector.shape_cast %38 : vector<1x16x2xf32> to vector<16x2xf32>
    %40 = vector.shape_cast %37 : vector<16x2xf32> to vector<1x16x2xf32>
    tpu.vector_store %arg7[%c0_14, %c0_15, %c0_16], %40 {strides = array<i32>} : memref<1x16x2xf32, #tpu.memory_space<vmem>>, vector<1x16x2xf32>,
    %41 = arith.truncf %16 : vector<16x128xf32> to vector<16x128xbf16>
    %c0_17 = arith.constant 0 : index
    %c0_18 = arith.constant 0 : index
    %42 = vector.load %arg6[%c0_17, %c0_18] : memref<16x128xbf16, #tpu.memory_space<vmem>>, vector<16x128xbf16>
    tpu.vector_store %arg6[%c0_17, %c0_18], %41 {strides = array<i32>} : memref<16x128xbf16, #tpu.memory_space<vmem>>, vector<16x128xbf16>,
    return
  }
  func.func @transform_0(%arg0: i32) -> (i32, i32) {
    %c0_i32 = arith.constant 0 : i32
    %c0_i32_0 = arith.constant 0 : i32
    %c0_i32_1 = arith.constant 0 : i32
    return %c0_i32, %c0_i32_0 : i32, i32
  }
  func.func @transform_1(%arg0: i32) -> (i32, i32) {
    %c0_i32 = arith.constant 0 : i32
    %c0_i32_0 = arith.constant 0 : i32
    %c0_i32_1 = arith.constant 0 : i32
    return %c0_i32, %c0_i32_0 : i32, i32
  }
  func.func @transform_2(%arg0: i32) -> (i32, i32) {
    %c0_i32 = arith.constant 0 : i32
    %c0_i32_0 = arith.constant 0 : i32
    %c0_i32_1 = arith.constant 0 : i32
    return %c0_i32, %c0_i32_0 : i32, i32
  }
  func.func @transform_3(%arg0: i32) -> (i32, i32) {
    %c0_i32 = arith.constant 0 : i32
    %c0_i32_0 = arith.constant 0 : i32
    %c0_i32_1 = arith.constant 0 : i32
    return %c0_i32, %c0_i32_0 : i32, i32
  }
  func.func @transform_4(%arg0: i32) -> (i32, i32) {
    %c0_i32 = arith.constant 0 : i32
    %c0_i32_0 = arith.constant 0 : i32
    return %c0_i32, %arg0 : i32, i32
  }
  func.func @transform_5(%arg0: i32) -> (i32, i32) {
    %c0_i32 = arith.constant 0 : i32
    %c0_i32_0 = arith.constant 0 : i32
    return %c0_i32, %arg0 : i32, i32
  }
  func.func @transform_6(%arg0: i32) -> (i32, i32, i32) {
    %c0_i32 = arith.constant 0 : i32
    %c0_i32_0 = arith.constant 0 : i32
    %c0_i32_1 = arith.constant 0 : i32
    return %arg0, %c0_i32, %c0_i32_0 : i32, i32, i32
  }
}

module attributes {stable_mosaic.version = 11 : i64} {
  func.func @_conv_kernel(%arg0: i32, %arg1: memref<32x256xbf16, #tpu.memory_space<vmem>>, %arg2: memref<32x1xf32, #tpu.memory_space<vmem>>, %arg3: memref<256x1xf32, #tpu.memory_space<vmem>>, %arg4: memref<256x1xf32, #tpu.memory_space<vmem>>, %arg5: memref<256x128xbf16, #tpu.memory_space<vmem>>, %arg6: memref<32x128xbf16, #tpu.memory_space<vmem>>, %arg7: memref<1x32x2xf32, #tpu.memory_space<vmem>>) attributes {dimension_semantics = [#tpu.dimension_semantics<parallel>], iteration_bounds = array<i64: 1>, scalar_prefetch = 0 : i64, scratch_operands = 0 : i64, tpu.core_type = #tpu.core_type<tc>, window_params = [{pipeline_mode = #tpu.pipeline_mode<synchronous>, transform_indices = @transform_0, window_bounds = array<i64: 32, 256>}, {pipeline_mode = #tpu.pipeline_mode<synchronous>, transform_indices = @transform_1, window_bounds = array<i64: 32, 1>}, {pipeline_mode = #tpu.pipeline_mode<synchronous>, transform_indices = @transform_2, window_bounds = array<i64: 256, 1>}, {pipeline_mode = #tpu.pipeline_mode<synchronous>, transform_indices = @transform_3, window_bounds = array<i64: 256, 1>}, {transform_indices = @transform_4, window_bounds = array<i64: 256, 128>}, {transform_indices = @transform_5, window_bounds = array<i64: 32, 128>}, {transform_indices = @transform_6, window_bounds = array<i64: 1, 32, 2>}]} {
    %c0 = arith.constant 0 : index
    %c0_0 = arith.constant 0 : index
    %0 = vector.load %arg5[%c0, %c0_0] : memref<256x128xbf16, #tpu.memory_space<vmem>>, vector<256x128xbf16>
    %1 = arith.extf %0 : vector<256x128xbf16> to vector<256x128xf32>
    %c0_1 = arith.constant 0 : index
    %c0_2 = arith.constant 0 : index
    %2 = vector.load %arg3[%c0_1, %c0_2] : memref<256x1xf32, #tpu.memory_space<vmem>>, vector<256x1xf32>
    %3 = vector.broadcast %2 : vector<256x1xf32> to vector<256x128xf32>
    %4 = arith.mulf %1, %3 : vector<256x128xf32>
    %c0_3 = arith.constant 0 : index
    %c0_4 = arith.constant 0 : index
    %5 = vector.load %arg4[%c0_3, %c0_4] : memref<256x1xf32, #tpu.memory_space<vmem>>, vector<256x1xf32>
    %6 = vector.broadcast %5 : vector<256x1xf32> to vector<256x128xf32>
    %7 = arith.addf %4, %6 : vector<256x128xf32>
    %cst = arith.constant 2.000000e-01 : f32
    %8 = vector.broadcast %cst : f32 to vector<256x128xf32>
    %9 = arith.mulf %8, %7 : vector<256x128xf32>
    %10 = arith.maximumf %7, %9 : vector<256x128xf32>
    %11 = arith.truncf %10 : vector<256x128xf32> to vector<256x128xbf16>
    %c0_5 = arith.constant 0 : index
    %c0_6 = arith.constant 0 : index
    %12 = vector.load %arg1[%c0_5, %c0_6] : memref<32x256xbf16, #tpu.memory_space<vmem>>, vector<32x256xbf16>
    %cst_7 = arith.constant dense<0.000000e+00> : vector<32x128xf32>
    %13 = tpu.matmul %12, %11, %cst_7 {dimension_numbers = #tpu.dot_dimension_numbers<[1], [0], [0], [1], [0, 0, 1, 1], [], []>} : vector<32x256xbf16>, vector<256x128xbf16>, vector<32x128xf32> -> vector<32x128xf32>
    %c0_8 = arith.constant 0 : index
    %c0_9 = arith.constant 0 : index
    %14 = vector.load %arg2[%c0_8, %c0_9] : memref<32x1xf32, #tpu.memory_space<vmem>>, vector<32x1xf32>
    %15 = vector.broadcast %14 : vector<32x1xf32> to vector<32x128xf32>
    %16 = arith.addf %13, %15 : vector<32x128xf32>
    %c128_i32 = arith.constant 128 : i32
    %17 = arith.muli %arg0, %c128_i32 : i32
    %18 = tpu.iota {dimensions = array<i32: 1>} : vector<32x128xi32>
    %19 = vector.broadcast %17 : i32 to vector<32x128xi32>
    %20 = arith.addi %19, %18 : vector<32x128xi32>
    %c32_i32 = arith.constant 32 : i32
    %21 = vector.broadcast %c32_i32 : i32 to vector<32x128xi32>
    %22 = arith.cmpi slt, %20, %21 : vector<32x128xi32>
    %cst_10 = arith.constant 0.000000e+00 : f32
    %23 = vector.broadcast %cst_10 : f32 to vector<32x128xf32>
    %24 = arith.select %22, %16, %23 : vector<32x128xi1>, vector<32x128xf32>
    %cst_11 = arith.constant dense<0.000000e+00> : vector<32xf32>
    %25 = vector.multi_reduction <add>, %24, %cst_11 [1] : vector<32x128xf32> to vector<32xf32>
    %26 = vector.shape_cast %25 : vector<32xf32> to vector<32x1xf32>
    %27 = arith.mulf %24, %24 : vector<32x128xf32>
    %cst_12 = arith.constant dense<0.000000e+00> : vector<32xf32>
    %28 = vector.multi_reduction <add>, %27, %cst_12 [1] : vector<32x128xf32> to vector<32xf32>
    %29 = vector.shape_cast %28 : vector<32xf32> to vector<32x1xf32>
    %30 = tpu.iota {dimensions = array<i32: 1>} : vector<32x2xi32>
    %c0_i32 = arith.constant 0 : i32
    %31 = vector.broadcast %c0_i32 : i32 to vector<32x2xi32>
    %32 = arith.cmpi eq, %30, %31 : vector<32x2xi32>
    %33 = vector.shape_cast %26 : vector<32x1xf32> to vector<32x1xf32>
    %34 = vector.broadcast %33 : vector<32x1xf32> to vector<32x2xf32>
    %35 = vector.shape_cast %29 : vector<32x1xf32> to vector<32x1xf32>
    %36 = vector.broadcast %35 : vector<32x1xf32> to vector<32x2xf32>
    %37 = arith.select %32, %34, %36 : vector<32x2xi1>, vector<32x2xf32>
    %c0_13 = arith.constant 0 : index
    %c0_14 = arith.constant 0 : index
    %c0_15 = arith.constant 0 : index
    %38 = vector.load %arg7[%c0_13, %c0_14, %c0_15] : memref<1x32x2xf32, #tpu.memory_space<vmem>>, vector<1x32x2xf32>
    %39 = vector.shape_cast %38 : vector<1x32x2xf32> to vector<32x2xf32>
    %40 = vector.shape_cast %37 : vector<32x2xf32> to vector<1x32x2xf32>
    tpu.vector_store %arg7[%c0_13, %c0_14, %c0_15], %40 {strides = array<i32>} : memref<1x32x2xf32, #tpu.memory_space<vmem>>, vector<1x32x2xf32>,
    %41 = arith.truncf %16 : vector<32x128xf32> to vector<32x128xbf16>
    %c0_16 = arith.constant 0 : index
    %c0_17 = arith.constant 0 : index
    %42 = vector.load %arg6[%c0_16, %c0_17] : memref<32x128xbf16, #tpu.memory_space<vmem>>, vector<32x128xbf16>
    tpu.vector_store %arg6[%c0_16, %c0_17], %41 {strides = array<i32>} : memref<32x128xbf16, #tpu.memory_space<vmem>>, vector<32x128xbf16>,
    return
  }
  func.func @transform_0(%arg0: i32) -> (i32, i32) {
    %c0_i32 = arith.constant 0 : i32
    %c0_i32_0 = arith.constant 0 : i32
    %c0_i32_1 = arith.constant 0 : i32
    return %c0_i32, %c0_i32_0 : i32, i32
  }
  func.func @transform_1(%arg0: i32) -> (i32, i32) {
    %c0_i32 = arith.constant 0 : i32
    %c0_i32_0 = arith.constant 0 : i32
    %c0_i32_1 = arith.constant 0 : i32
    return %c0_i32, %c0_i32_0 : i32, i32
  }
  func.func @transform_2(%arg0: i32) -> (i32, i32) {
    %c0_i32 = arith.constant 0 : i32
    %c0_i32_0 = arith.constant 0 : i32
    %c0_i32_1 = arith.constant 0 : i32
    return %c0_i32, %c0_i32_0 : i32, i32
  }
  func.func @transform_3(%arg0: i32) -> (i32, i32) {
    %c0_i32 = arith.constant 0 : i32
    %c0_i32_0 = arith.constant 0 : i32
    %c0_i32_1 = arith.constant 0 : i32
    return %c0_i32, %c0_i32_0 : i32, i32
  }
  func.func @transform_4(%arg0: i32) -> (i32, i32) {
    %c0_i32 = arith.constant 0 : i32
    %c0_i32_0 = arith.constant 0 : i32
    return %c0_i32, %arg0 : i32, i32
  }
  func.func @transform_5(%arg0: i32) -> (i32, i32) {
    %c0_i32 = arith.constant 0 : i32
    %c0_i32_0 = arith.constant 0 : i32
    return %c0_i32, %arg0 : i32, i32
  }
  func.func @transform_6(%arg0: i32) -> (i32, i32, i32) {
    %c0_i32 = arith.constant 0 : i32
    %c0_i32_0 = arith.constant 0 : i32
    %c0_i32_1 = arith.constant 0 : i32
    return %arg0, %c0_i32, %c0_i32_0 : i32, i32, i32
  }
}

</mosaic_0001>

<bundles_post_ra>
// kernel: modified_discriminator_forward.3
= control target key start
LH: loop header
LB: loop body
LE: loop exit
PB: predicated region body
PF: predicated region fallthrough
CT: control target
= control target key end

     0   :  { %s482_s12 = smov 0   ;;  %s484_s13 = smov 0   ;;  %s540_s0 = inlined_call_operand.vmem [shape: bf16[8,48], index: 0, kind: input, shape index: {}]   ;;  %s541_s1 = inlined_call_operand.vmem [shape: f32[8,1], index: 1, kind: input, shape index: {}]   ;;  %s542_s2 = inlined_call_operand.vmem [shape: bf16[48,512], index: 2, kind: input, shape index: {}]   ;;  %s543_s3 = inlined_call_operand.vmem [shape: f32[8,512], index: 3, kind: output, shape index: {}]  }
   0x1   :  { %s486_s14 = smov 0  }
   0x2 LB: > { %s381_s15 = sadd.s32 4294967295, %s459_s14   ;;  %s499_s16 = sadd.s32 1, %s459_s14   ;;  %s459_s14 = sphi %s486_s14, %s546_s14   ;;  %s455_s13 = sphi %s484_s13, %s545_s13   ;;  %s451_s12 = sphi %s482_s12, %s544_s12  }
   0x3   : > { %s59_s17 = ssub.s32 %s459_s14, %s499_s16  ;;  %s62_s18 = sadd.s32 1, %s455_s13 }
   0x4   : > { %p60_p0 = scmp.eq.s32.totalorder %s59_s17, 0  ;;  %p69_p1 = scmp.ne.s32.totalorder %s455_s13, %s451_s12 }
   0x5   : > { %p70_p2 = scmp.eq.s32.totalorder %s459_s14, 0  ;;  %p384_p4 = scmp.ge.s32.totalorder %s459_s14, 2 }
   0x6   : > { %s508_s19 = scalar_select %p60_p0, %s455_s13, %s62_s18  }
   0x7   : > { %p71_p3 = por %p70_p2, %p69_p1  ;;  %127 = sbr.rel (%p384_p4) target bundleno = 21 (0x15), region = 24 }
   0xe   : > { %130 = sbr.rel (!%p71_p3) target bundleno = 21 (0x15), region = 28  ;;  %s132_s20 = sand.u32 (%p71_p3), 1, %s455_s13  }
   0xf   : > { %s399_s21 = sshll.u32 (%p71_p3), %s459_s14, 3  ;;  %s400_s22 = smul.u32 (%p71_p3), 48, %s132_s20 }
  0x10   : > { %s137_s25 = scalar_lea.vmem (%p71_p3), %s542_s2, %s399_s21 }
  0x11   : > { %v175_v0 = vld [vmem:[%s137_s25] sm:$0xff] (%p71_p3)  ;;  %v177_v1 = vld [vmem:[%s137_s25 + $0x10] sm:$0xff] (%p71_p3)  ;;  %s134_s26 = scalar_lea.vmem (%p71_p3), [#allocation2], %s400_s22 }
  0x12   : > { %v179_v2 = vld [vmem:[%s137_s25 + $0x20] sm:$0xff] (%p71_p3)  ;;  %v181_v3 = vld [vmem:[%s137_s25 + $0x30] sm:$0xff] (%p71_p3)  ;;  %176 = vst [vmem:[%s134_s26] sm:$0xff] (%p71_p3), %v175_v0  ;;  %178 = vst [vmem:[%s134_s26 + $0x8] sm:$0xff] (%p71_p3), %v177_v1 }
  0x13   : > { %v183_v4 = vld [vmem:[%s137_s25 + $0x40] sm:$0xff] (%p71_p3)  ;;  %v185_v5 = vld [vmem:[%s137_s25 + $0x50] sm:$0xff] (%p71_p3)  ;;  %180 = vst [vmem:[%s134_s26 + $0x10] sm:$0xff] (%p71_p3), %v179_v2  ;;  %182 = vst [vmem:[%s134_s26 + $0x18] sm:$0xff] (%p71_p3), %v181_v3 }
  0x14   : > { %184 = vst [vmem:[%s134_s26 + $0x20] sm:$0xff] (%p71_p3), %v183_v4  ;;  %186 = vst [vmem:[%s134_s26 + $0x28] sm:$0xff] (%p71_p3), %v185_v5 }
  0x15 PF: > { %p387_p5 = scmp.ge.s32.totalorder %s459_s14, 1  ;;  %p191_p6 = scmp.lt.s32.totalorder %s459_s14, 3 }
  0x17   : > { %p192_p7 = pnand %p387_p5, %p191_p6 }
  0x18   : > { %s198_s27 = sand.u32 (!%p192_p7), 1, %s451_s12   ;;  %v236_v6 = vld [vmem:[%s541_s1] sm:$0xff] (!%p192_p7)  ;;  %v461_v7 = vmov (!%p192_p7), 0   ;;  %vm272_vm0 = vcmask (!%p192_p7), 392192   ;;  %s388_s7 = sshll.u32 (!%p192_p7), %s381_s15, 1 }
  0x19   : > { %195 = sbr.rel (%p192_p7) target bundleno = 258 (0x102), region = 66  ;;  %308 = vmatprep.mubr.bf16.mxu0 (!%p192_p7), %v461_v7  ;;  %427 = vset.pattern.permute.xlu0 (!%p192_p7), %v461_v7  ;;  %v235_v14 = vld [vmem:[%s540_s0] sm:$0xf] (!%p192_p7)  ;;  %p223_p8 = scmp.lt.s32.totalorder (!%p192_p7), %s388_s7, 3 }
  0x1a   : > { %s401_s30 = smul.u32 (!%p192_p7), 48, %s198_s27  ;;  %239 = vperm.xlu0 (!%p192_p7), %427, %v236_v6  }
  0x1c   : > { %s200_s4 = scalar_lea.vmem (!%p192_p7), [#allocation2], %s401_s30 }
  0x1d   : > { %v428_v8 = vld [vmem:[%s200_s4 + $0x4] ss:$8 sps:$4 sm:$0xff] (!%p192_p7)   ;;  %v430_v9 = vld [vmem:[%s200_s4] ss:$8 sps:$4 sm:$0xff] (!%p192_p7)   ;;  %v431_v10 = vld [vmem:[%s200_s4 + $0x14] ss:$8 sps:$4 sm:$0xff] (!%p192_p7)  }
  0x1e   : > { %276 = vmatprep.subr.bf16.mxu0 (!%p192_p7), %v428_v8  ;;  %v433_v11 = vld [vmem:[%s200_s4 + $0x10] ss:$8 sps:$4 sm:$0xff] (!%p192_p7)   ;;  %v434_v12 = vld [vmem:[%s200_s4 + $0x24] ss:$8 sps:$4 sm:$0xff] (!%p192_p7)   ;;  %v436_v13 = vld [vmem:[%s200_s4 + $0x20] ss:$8 sps:$4 sm:$0xff] (!%p192_p7)  }
  0x1f   : > { %277 = vmatpush1.bf16.msra.mxu0 (!%p192_p7), %v430_v9 }
  0x20   : > { %278 = vmatprep.subr.bf16.mxu0 %v431_v10  ;;  %s548_s7 = smov (!%p223_p8, %s388_s7), 3 }
  0x21   : > { %s389_s8 = sshll.u32 %s548_s7, 3 }
  0x22   : > { %s226_s11 = scalar_lea.vmem %s543_s3, %s389_s8 }
  0x23   : > { %279 = vmatpush1.bf16.msra.mxu0 %v433_v11 }
  0x24   : > { %280 = vmatprep.subr.bf16.mxu0 %v434_v12 }
  0x27   : > { %281 = vmatpush1.bf16.msra.mxu0 %v436_v13 }
  0x2a   : > { %396 = vmatmul.mubr.msk.bf16.vlgmr.msra.gmra.mrb[0].mxu0 %vm272_vm0, %v235_v14 }
  0x99   : > { %v240_v15 = vpop.permute.xlu0 %239 }
  0xfd   : > { %v310_v16 = vpop.f32.mrb[0].mxu0 }
  0xfe   : > { %v311_v17 = vadd.f32 %v310_v16, %v240_v15  ;;  %v312_v18 = vpop.f32.mrb[1].mxu0 }
  0xff   : > { %v313_v19 = vadd.f32 %v312_v18, %v240_v15  ;;  %v314_v20 = vpop.f32.mrb[2].mxu0 }
 0x100   : > { %317 = vst [vmem:[%s226_s11] sm:$0xff] %v311_v17  ;;  %v315_v21 = vpop.f32.mrb[3].mxu0 }
 0x101   : > { %318 = vst [vmem:[%s226_s11 + $0x8] sm:$0xff] %v313_v19 }
 0x102 PF: > { %p10_p9 = scmp.ge.s32.totalorder %s499_s16, 4   ;;  %s544_s12 = smov %s455_s13 }
 0x103   : > { %s545_s13 = smov %s508_s19  ;;  %s546_s14 = smov %s499_s16 }
 0x104   :  { %12 = sbr.rel (!%p10_p9) target bundleno = 2 (0x2), region = 105 }

// kernel: modified_discriminator_forward.4
= control target key start
LH: loop header
LB: loop body
LE: loop exit
PB: predicated region body
PF: predicated region fallthrough
CT: control target
= control target key end

     0   :  { %v506_v0 = vmov 0   ;;  %v507_v11 = vmov 0.0   ;;  %vm508_vm0 = vmmov 0   ;;  %vm401_vm2 = vcmask 15360   ;;  %s691_s3 = inlined_call_operand.vmem [shape: f32[128,1], index: 3, kind: input, shape index: {}]   ;;  %s692_s2 = inlined_call_operand.vmem [shape: f32[128,1], index: 2, kind: input, shape index: {}]   ;;  %s693_s1 = inlined_call_operand.vmem [shape: f32[16,1], index: 1, kind: input, shape index: {}]   ;;  %s694_s0 = inlined_call_operand.vmem [shape: bf16[16,128], index: 0, kind: input, shape index: {}]   ;;  %s695_s4 = inlined_call_operand.vmem [shape: bf16[128,128], index: 4, kind: input, shape index: {}]   ;;  %s696_s5 = inlined_call_operand.vmem [shape: bf16[16,128], index: 5, kind: output, shape index: {0}]   ;;  %s697_s6 = inlined_call_operand.vmem [shape: f32[1,16,2], index: 6, kind: output, shape index: {1}]  }
   0x1   :  { %504 = vset.pattern.permute.xlu1 %v506_v0  ;;  %503 = vset.pattern.permute.xlu0 %v506_v0  ;;  %v167_v1 = vld [vmem:[%s691_s3] sm:$0xff]  ;;  %v168_v3 = vld [vmem:[%s691_s3 + $0x8] sm:$0xff]  ;;  %v58_v5 = vld [vmem:[%s692_s2 + $0x18] sm:$0xff] }
   0x2   :  { %v55_v2 = vld [vmem:[%s692_s2] sm:$0xff]  ;;  %185 = vperm.xlu1 %504, %v167_v1   ;;  %v56_v4 = vld [vmem:[%s692_s2 + $0x8] sm:$0xff]  ;;  %v57_v6 = vld [vmem:[%s692_s2 + $0x10] sm:$0xff]  ;;  %480 = vmatprep.subr.bf16.mxu0 %v507_v11 }
   0x3   :  { %73 = vperm.xlu0 %503, %v55_v2   ;;  %v170_v7 = vld [vmem:[%s691_s3 + $0x18] sm:$0xff]  ;;  %v169_v8 = vld [vmem:[%s691_s3 + $0x10] sm:$0xff]  ;;  %v60_v9 = vld [vmem:[%s692_s2 + $0x28] sm:$0xff]  ;;  %496 = vmatprep.mubr.msk.bf16.mxu0 %vm508_vm0, %v507_v11 }
   0x4   :  { %v59_v10 = vld [vmem:[%s692_s2 + $0x20] sm:$0xff]  ;;  %v172_v12 = vld [vmem:[%s691_s3 + $0x28] sm:$0xff]  ;;  %v62_v14 = vld [vmem:[%s692_s2 + $0x38] sm:$0xff] }
   0x5   :  { %v171_v13 = vld [vmem:[%s691_s3 + $0x20] sm:$0xff]  ;;  %v61_v15 = vld [vmem:[%s692_s2 + $0x30] sm:$0xff]  ;;  %v174_v16 = vld [vmem:[%s691_s3 + $0x38] sm:$0xff] }
   0x6   :  { %190 = vperm.xlu1 %504, %v168_v3   ;;  %v173_v17 = vld [vmem:[%s691_s3 + $0x30] sm:$0xff]  ;;  %v64_v18 = vld [vmem:[%s692_s2 + $0x48] sm:$0xff]  ;;  %v63_v19 = vld [vmem:[%s692_s2 + $0x40] sm:$0xff] }
   0x7   :  { %78 = vperm.xlu0 %503, %v56_v4   ;;  %v176_v20 = vld [vmem:[%s691_s3 + $0x48] sm:$0xff]  ;;  %v175_v21 = vld [vmem:[%s691_s3 + $0x40] sm:$0xff]  ;;  %v66_v22 = vld [vmem:[%s692_s2 + $0x58] sm:$0xff] }
   0x8   :  { %v65_v23 = vld [vmem:[%s692_s2 + $0x50] sm:$0xff]  ;;  %v178_v24 = vld [vmem:[%s691_s3 + $0x58] sm:$0xff]  ;;  %v68_v26 = vld [vmem:[%s692_s2 + $0x68] sm:$0xff] }
   0x9   :  { %v177_v25 = vld [vmem:[%s691_s3 + $0x50] sm:$0xff]  ;;  %v67_v27 = vld [vmem:[%s692_s2 + $0x60] sm:$0xff]  ;;  %v180_v28 = vld [vmem:[%s691_s3 + $0x68] sm:$0xff] }
   0xa   :  { %88 = vperm.xlu1 %504, %v58_v5   ;;  %v179_v29 = vld [vmem:[%s691_s3 + $0x60] sm:$0xff]  ;;  %v70_v30 = vld [vmem:[%s692_s2 + $0x78] sm:$0xff]  ;;  %v69_v31 = vld [vmem:[%s692_s2 + $0x70] sm:$0xff] }
   0xb   :  { %83 = vperm.xlu0 %503, %v57_v6   ;;  %v182_v32 = vld [vmem:[%s691_s3 + $0x78] sm:$0xff]  ;;  %v181_v33 = vld [vmem:[%s691_s3 + $0x70] sm:$0xff]  ;;  %v322_v34 = vld [vmem:[%s693_s1 + $0x8] sm:$0xff] }
   0xc   :  { %v321_v35 = vld [vmem:[%s693_s1] sm:$0xff]  ;;  %v464_v45 = vld [vmem:[%s695_s4 + $0x8] sm:$0xff]   ;;  %v465_v60 = vld [vmem:[%s695_s4 + $0x10] sm:$0xff]  }
   0xd   :  { %v428_v36 = vld [vmem:[%s695_s4] sm:$0xff]   ;;  %v434_v49 = vunpack.c.h.bf16 %v464_v45  ;;  %v433_v50 = vunpack.c.l.bf16 %v464_v45  ;;  %v438_v2 = vunpack.c.h.bf16 %v465_v60  ;;  %v437_v3 = vunpack.c.l.bf16 %v465_v60 }
   0xe   :  { %200 = vperm.xlu1 %504, %v170_v7   ;;  %v429_v37 = vunpack.c.l.bf16 %v428_v36  ;;  %v430_v41 = vunpack.c.h.bf16 %v428_v36 }
   0xf   :  { %195 = vperm.xlu0 %503, %v169_v8  }
  0x12   :  { %98 = vperm.xlu1 %504, %v60_v9  }
  0x13   :  { %93 = vperm.xlu0 %503, %v59_v10  }
  0x16   :  { %210 = vperm.xlu1 %504, %v172_v12  }
  0x17   :  { %205 = vperm.xlu0 %503, %v171_v13  }
  0x1a   :  { %108 = vperm.xlu1 %504, %v62_v14   ;;  %v466_v14 = vld [vmem:[%s695_s4 + $0x18] sm:$0xff]  }
  0x1b   :  { %103 = vperm.xlu0 %503, %v61_v15  }
  0x1e   :  { %220 = vperm.xlu1 %504, %v174_v16  }
  0x1f   :  { %215 = vperm.xlu0 %503, %v173_v17  }
  0x22   :  { %118 = vperm.xlu1 %504, %v64_v18  }
  0x23   :  { %113 = vperm.xlu0 %503, %v63_v19   ;;  %v442_v19 = vunpack.c.h.bf16 %v466_v14 }
  0x26   :  { %230 = vperm.xlu1 %504, %v176_v20   ;;  %v441_v20 = vunpack.c.l.bf16 %v466_v14 }
  0x27   :  { %225 = vperm.xlu0 %503, %v175_v21  }
  0x2a   :  { %128 = vperm.xlu1 %504, %v66_v22  }
  0x2b   :  { %123 = vperm.xlu0 %503, %v65_v23  }
  0x2e   :  { %240 = vperm.xlu1 %504, %v178_v24  }
  0x2f   :  { %235 = vperm.xlu0 %503, %v177_v25  }
  0x32   :  { %138 = vperm.xlu1 %504, %v68_v26  }
  0x33   :  { %133 = vperm.xlu0 %503, %v67_v27  }
  0x36   :  { %250 = vperm.xlu1 %504, %v180_v28  }
  0x37   :  { %245 = vperm.xlu0 %503, %v179_v29  }
  0x3a   :  { %148 = vperm.xlu1 %504, %v70_v30   ;;  %v467_v30 = vld [vmem:[%s695_s4 + $0x20] sm:$0xff]  }
  0x3b   :  { %143 = vperm.xlu0 %503, %v69_v31   ;;  %v445_v36 = vunpack.c.l.bf16 %v467_v30 }
  0x3e   :  { %260 = vperm.xlu1 %504, %v182_v32  }
  0x3f   :  { %255 = vperm.xlu0 %503, %v181_v33  }
  0x42   :  { %330 = vperm.xlu1 %504, %v322_v34  }
  0x43   :  { %325 = vperm.xlu0 %503, %v321_v35   ;;  %v446_v35 = vunpack.c.h.bf16 %v467_v30 }
  0x81   :  { %v186_v38 = vpop.permute.xlu1 %185 }
  0x82   :  { %v74_v39 = vpop.permute.xlu0 %73 }
  0x83   :  { %v151_v40 = vmul.f32 %v429_v37, %v74_v39 }
  0x85   :  { %v263_v42 = vadd.f32 %v186_v38, %v151_v40  ;;  %v191_v43 = vpop.permute.xlu1 %190 }
  0x86   :  { %v79_v44 = vpop.permute.xlu0 %78 }
  0x87   :  { %v152_v46 = vmul.f32 %v430_v41, %v79_v44  ;;  %v279_v47 = vmul.f32 0.2, %v263_v42 }
  0x89   :  { %v264_v48 = vadd.f32 %v191_v43, %v152_v46  ;;  %v89_v51 = vpop.permute.xlu1 %88  ;;  %v295_v56 = vmax.f32 %v263_v42, %v279_v47  ;;  %v468_v46 = vld [vmem:[%s695_s4 + $0x28] sm:$0xff]  }
  0x8a   :  { %v84_v52 = vpop.permute.xlu0 %83  ;;  %v154_v54 = vmul.f32 %v434_v49, %v89_v51  ;;  %v450_v51 = vunpack.c.h.bf16 %v468_v46 }
  0x8b   :  { %v280_v53 = vmul.f32 0.2, %v264_v48  ;;  %v153_v55 = vmul.f32 %v433_v50, %v84_v52  ;;  %v449_v52 = vunpack.c.l.bf16 %v468_v46 }
  0x8d   :  { %v296_v57 = vmax.f32 %v264_v48, %v280_v53  ;;  %v201_v58 = vpop.permute.xlu1 %200 }
  0x8e   :  { %v196_v59 = vpop.permute.xlu0 %195  ;;  %v266_v61 = vadd.f32 %v201_v58, %v154_v54 }
  0x8f   :  { %v265_v62 = vadd.f32 %v196_v59, %v153_v55  ;;  %v311_v63 = vpack.c.bf16 %v296_v57, %v295_v56 }
  0x90   :  { %v282_v0 = vmul.f32 0.2, %v266_v61 }
  0x91   :  { %v281_v1 = vmul.f32 0.2, %v265_v62  ;;  %481 = vmatpush3.bf16.msra.mxu0 %v311_v63  ;;  %v99_v4 = vpop.permute.xlu1 %98 }
  0x92   :  { %v94_v5 = vpop.permute.xlu0 %93  ;;  %482 = vmatprep.subr.bf16.mxu0 %v507_v11  ;;  %v298_v6 = vmax.f32 %v266_v61, %v282_v0  ;;  %v156_v8 = vmul.f32 %v438_v2, %v99_v4 }
  0x93   :  { %v297_v7 = vmax.f32 %v265_v62, %v281_v1  ;;  %v155_v9 = vmul.f32 %v437_v3, %v94_v5  ;;  %v469_v62 = vld [vmem:[%s695_s4 + $0x30] sm:$0xff]  }
  0x94   :  { %v454_v3 = vunpack.c.h.bf16 %v469_v62  ;;  %v453_v4 = vunpack.c.l.bf16 %v469_v62 }
  0x95   :  { %v312_v10 = vpack.c.bf16 %v298_v6, %v297_v7  ;;  %v211_v12 = vpop.permute.xlu1 %210 }
  0x96   :  { %v206_v13 = vpop.permute.xlu0 %205  ;;  %v268_v15 = vadd.f32 %v211_v12, %v156_v8 }
  0x97   :  { %v267_v16 = vadd.f32 %v206_v13, %v155_v9  ;;  %483 = vmatpush3.bf16.msra.mxu0 %v312_v10 }
  0x98   :  { %484 = vmatprep.subr.bf16.mxu0 %v507_v11  ;;  %v284_v17 = vmul.f32 0.2, %v268_v15 }
  0x99   :  { %v283_v18 = vmul.f32 0.2, %v267_v16  ;;  %v109_v21 = vpop.permute.xlu1 %108 }
  0x9a   :  { %v104_v22 = vpop.permute.xlu0 %103  ;;  %v300_v23 = vmax.f32 %v268_v15, %v284_v17  ;;  %v158_v25 = vmul.f32 %v442_v19, %v109_v21  ;;  %v470_v15 = vld [vmem:[%s695_s4 + $0x38] sm:$0xff]  }
  0x9b   :  { %v299_v24 = vmax.f32 %v267_v16, %v283_v18  ;;  %v157_v26 = vmul.f32 %v441_v20, %v104_v22  ;;  %v458_v20 = vunpack.c.h.bf16 %v470_v15  ;;  %v457_v21 = vunpack.c.l.bf16 %v470_v15 }
  0x9d   :  { %v313_v27 = vpack.c.bf16 %v300_v23, %v299_v24  ;;  %v221_v28 = vpop.permute.xlu1 %220 }
  0x9e   :  { %v216_v29 = vpop.permute.xlu0 %215  ;;  %v270_v31 = vadd.f32 %v221_v28, %v158_v25 }
  0x9f   :  { %v269_v32 = vadd.f32 %v216_v29, %v157_v26  ;;  %485 = vmatpush3.bf16.msra.mxu0 %v313_v27 }
  0xa0   :  { %486 = vmatprep.subr.bf16.mxu0 %v507_v11  ;;  %v286_v33 = vmul.f32 0.2, %v270_v31 }
  0xa1   :  { %v285_v34 = vmul.f32 0.2, %v269_v32  ;;  %v119_v37 = vpop.permute.xlu1 %118 }
  0xa2   :  { %v114_v38 = vpop.permute.xlu0 %113  ;;  %v302_v39 = vmax.f32 %v270_v31, %v286_v33  ;;  %v160_v41 = vmul.f32 %v446_v35, %v119_v37 }
  0xa3   :  { %v301_v40 = vmax.f32 %v269_v32, %v285_v34  ;;  %v159_v42 = vmul.f32 %v445_v36, %v114_v38  ;;  %v505_v38 = vld [vmem:[%s694_s0] sm:$0xff]  }
  0xa5   :  { %v314_v43 = vpack.c.bf16 %v302_v39, %v301_v40  ;;  %v231_v44 = vpop.permute.xlu1 %230 }
  0xa6   :  { %v226_v45 = vpop.permute.xlu0 %225  ;;  %v272_v47 = vadd.f32 %v231_v44, %v160_v41 }
  0xa7   :  { %v271_v48 = vadd.f32 %v226_v45, %v159_v42  ;;  %487 = vmatpush3.bf16.msra.mxu0 %v314_v43 }
  0xa8   :  { %488 = vmatprep.subr.bf16.mxu0 %v507_v11  ;;  %v288_v49 = vmul.f32 0.2, %v272_v47 }
  0xa9   :  { %v287_v50 = vmul.f32 0.2, %v271_v48  ;;  %v129_v53 = vpop.permute.xlu1 %128 }
  0xaa   :  { %v124_v54 = vpop.permute.xlu0 %123  ;;  %v304_v55 = vmax.f32 %v272_v47, %v288_v49  ;;  %v162_v57 = vmul.f32 %v450_v51, %v129_v53  ;;  %v381_v49 = vlaneseq }
  0xab   :  { %v303_v56 = vmax.f32 %v271_v48, %v287_v50  ;;  %v161_v58 = vmul.f32 %v449_v52, %v124_v54 }
  0xac   :  { %v382_v50 = vand.u32 127, %v381_v49 }
  0xad   :  { %v315_v59 = vpack.c.bf16 %v304_v55, %v303_v56  ;;  %v241_v60 = vpop.permute.xlu1 %240 }
  0xae   :  { %v236_v61 = vpop.permute.xlu0 %235  ;;  %v274_v63 = vadd.f32 %v241_v60, %v162_v57  ;;  %vm398_vm1 = vcmp.eq.s32.totalorder %v382_v50, 0 }
  0xaf   :  { %v273_v0 = vadd.f32 %v236_v61, %v161_v58  ;;  %489 = vmatpush3.bf16.msra.mxu0 %v315_v59 }
  0xb0   :  { %490 = vmatprep.subr.bf16.mxu0 %v507_v11  ;;  %v290_v1 = vmul.f32 0.2, %v274_v63 }
  0xb1   :  { %v289_v2 = vmul.f32 0.2, %v273_v0  ;;  %v139_v5 = vpop.permute.xlu1 %138 }
  0xb2   :  { %v134_v6 = vpop.permute.xlu0 %133  ;;  %v306_v7 = vmax.f32 %v274_v63, %v290_v1  ;;  %v164_v9 = vmul.f32 %v454_v3, %v139_v5 }
  0xb3   :  { %v305_v8 = vmax.f32 %v273_v0, %v289_v2  ;;  %v163_v10 = vmul.f32 %v453_v4, %v134_v6 }
  0xb5   :  { %v316_v12 = vpack.c.bf16 %v306_v7, %v305_v8  ;;  %v251_v13 = vpop.permute.xlu1 %250 }
  0xb6   :  { %v246_v14 = vpop.permute.xlu0 %245  ;;  %v276_v16 = vadd.f32 %v251_v13, %v164_v9 }
  0xb7   :  { %v275_v17 = vadd.f32 %v246_v14, %v163_v10  ;;  %491 = vmatpush3.bf16.msra.mxu0 %v316_v12 }
  0xb8   :  { %492 = vmatprep.subr.bf16.mxu0 %v507_v11  ;;  %v292_v18 = vmul.f32 0.2, %v276_v16 }
  0xb9   :  { %v291_v19 = vmul.f32 0.2, %v275_v17  ;;  %v149_v22 = vpop.permute.xlu1 %148 }
  0xba   :  { %v144_v23 = vpop.permute.xlu0 %143  ;;  %v308_v24 = vmax.f32 %v276_v16, %v292_v18  ;;  %v166_v26 = vmul.f32 %v458_v20, %v149_v22 }
  0xbb   :  { %v307_v25 = vmax.f32 %v275_v17, %v291_v19  ;;  %v165_v27 = vmul.f32 %v457_v21, %v144_v23 }
  0xbd   :  { %v317_v28 = vpack.c.bf16 %v308_v24, %v307_v25  ;;  %v261_v29 = vpop.permute.xlu1 %260 }
  0xbe   :  { %v256_v30 = vpop.permute.xlu0 %255  ;;  %v278_v31 = vadd.f32 %v261_v29, %v166_v26 }
  0xbf   :  { %v277_v32 = vadd.f32 %v256_v30, %v165_v27  ;;  %493 = vmatpush3.bf16.msra.mxu0 %v317_v28 }
  0xc0   :  { %494 = vmatprep.subr.bf16.mxu0 %v507_v11  ;;  %v294_v33 = vmul.f32 0.2, %v278_v31 }
  0xc1   :  { %v293_v34 = vmul.f32 0.2, %v277_v32  ;;  %v331_v43 = vpop.permute.xlu1 %330 }
  0xc2   :  { %v310_v35 = vmax.f32 %v278_v31, %v294_v33  ;;  %v326_v39 = vpop.permute.xlu0 %325 }
  0xc3   :  { %v309_v36 = vmax.f32 %v277_v32, %v293_v34 }
  0xc5   :  { %v318_v37 = vpack.c.bf16 %v310_v35, %v309_v36 }
  0xc7   :  { %495 = vmatpush3.bf16.msra.mxu0 %v318_v37 }
  0xca   :  { %497 = vmatmul.mubr.bf16.vlgmr.msra.gmra.mrb[0].mxu0 %v505_v38 }
 0x19d   :  { %v373_v40 = vpop.f32.mrb[0].mxu0 }
 0x19e   :  { %v374_v41 = vadd.f32 %v373_v40, %v326_v39  ;;  %v498_v42 = vpop.f32.mrb[1].mxu0 }
 0x19f   :  { %v376_v44 = vpop.f32.mrb[2].mxu0 }
 0x1a0   :  { %v377_v45 = vadd.f32 %v376_v44, %v331_v43  ;;  %388 = vadd.xlane.f32.xlu0 %v374_v41  ;;  %v499_v11 = vpop.f32.mrb[3].mxu0  ;;  %v392_v47 = vmul.f32 %v374_v41, %v374_v41 }
 0x1a2   :  { %v462_v46 = vpack.c.bf16 %v377_v45, %v374_v41  ;;  %390 = vadd.xlane.f32.xlu1 %v377_v45  ;;  %v393_v48 = vmul.f32 %v377_v45, %v377_v45 }
 0x1a4   :  { %463 = vst [vmem:[%s696_s5] sm:$0xff] %v462_v46   ;;  %394 = vadd.xlane.f32.xlu0 %v392_v47 }
 0x1a8   :  { %396 = vadd.xlane.f32.xlu0 %v393_v48 }
 0x22d   :  { %v389_v51 = vpop.xlane.xlu0 %388 }
 0x22f   :  { %v391_v54 = vpop.xlane.xlu1 %390 }
 0x231   :  { %v395_v52 = vpop.xlane.xlu0 %394 }
 0x232   :  { %v399_v53 = vsel %vm398_vm1, %v389_v51, %v395_v52 }
 0x233   :  { %402 = vst.msk [vmem:[%s697_s6] sm:$0xff] %vm401_vm2, %v399_v53 }
 0x235   :  { %v397_v55 = vpop.xlane.xlu0 %396 }
 0x236   :  { %v400_v56 = vsel %vm398_vm1, %v391_v54, %v397_v55 }
 0x237   :  { %403 = vst.msk [vmem:[%s697_s6 + $0x8] sm:$0xff] %vm401_vm2, %v400_v56 }

// kernel: modified_discriminator_forward.5
= control target key start
LH: loop header
LB: loop body
LE: loop exit
PB: predicated region body
PF: predicated region fallthrough
CT: control target
= control target key end

     0   :  { %v935_v0 = vmov 0   ;;  %vm747_vm2 = vcmask 15360   ;;  %s1257_s2 = inlined_call_operand.vmem [shape: f32[256,1], index: 2, kind: input, shape index: {}]   ;;  %s1258_s3 = inlined_call_operand.vmem [shape: f32[256,1], index: 3, kind: input, shape index: {}]   ;;  %s1259_s1 = inlined_call_operand.vmem [shape: f32[32,1], index: 1, kind: input, shape index: {}]   ;;  %s1260_s4 = inlined_call_operand.vmem [shape: bf16[256,128], index: 4, kind: input, shape index: {}]   ;;  %s1261_s0 = inlined_call_operand.vmem [shape: bf16[32,256], index: 0, kind: input, shape index: {}]   ;;  %s1262_s5 = inlined_call_operand.vmem [shape: bf16[32,128], index: 5, kind: output, shape index: {0}]   ;;  %s1263_s6 = inlined_call_operand.vmem [shape: f32[1,32,2], index: 6, kind: output, shape index: {1}]  }
   0x1   :  { %928 = vset.pattern.permute.xlu1 %v935_v0  ;;  %927 = vset.pattern.permute.xlu0 %v935_v0  ;;  %v103_v1 = vld [vmem:[%s1257_s2 + $0x80] sm:$0xff]  ;;  %v104_v3 = vld [vmem:[%s1257_s2 + $0x88] sm:$0xff]  ;;  %v105_v9 = vld [vmem:[%s1257_s2 + $0x90] sm:$0xff] }
   0x2   :  { %v87_v2 = vld [vmem:[%s1257_s2] sm:$0xff]  ;;  %201 = vperm.xlu0 %927, %v103_v1   ;;  %v88_v4 = vld [vmem:[%s1257_s2 + $0x8] sm:$0xff]  ;;  %v106_v10 = vld [vmem:[%s1257_s2 + $0x98] sm:$0xff] }
   0x3   :  { %121 = vperm.xlu1 %928, %v87_v2   ;;  %v327_v5 = vld [vmem:[%s1258_s3 + $0x80] sm:$0xff]  ;;  %v328_v6 = vld [vmem:[%s1258_s3 + $0x88] sm:$0xff]  ;;  %v89_v11 = vld [vmem:[%s1257_s2 + $0x10] sm:$0xff] }
   0x4   :  { %v311_v7 = vld [vmem:[%s1258_s3] sm:$0xff]  ;;  %v312_v8 = vld [vmem:[%s1258_s3 + $0x8] sm:$0xff]  ;;  %v90_v12 = vld [vmem:[%s1257_s2 + $0x18] sm:$0xff] }
   0x5   :  { %v329_v13 = vld [vmem:[%s1258_s3 + $0x90] sm:$0xff]  ;;  %v330_v14 = vld [vmem:[%s1258_s3 + $0x98] sm:$0xff]  ;;  %v107_v17 = vld [vmem:[%s1257_s2 + $0xa0] sm:$0xff] }
   0x6   :  { %206 = vperm.xlu0 %927, %v104_v3   ;;  %v313_v15 = vld [vmem:[%s1258_s3 + $0x10] sm:$0xff]  ;;  %v314_v16 = vld [vmem:[%s1258_s3 + $0x18] sm:$0xff]  ;;  %v108_v18 = vld [vmem:[%s1257_s2 + $0xa8] sm:$0xff] }
   0x7   :  { %126 = vperm.xlu1 %928, %v88_v4   ;;  %v91_v19 = vld [vmem:[%s1257_s2 + $0x20] sm:$0xff]  ;;  %v92_v20 = vld [vmem:[%s1257_s2 + $0x28] sm:$0xff]  ;;  %v109_v25 = vld [vmem:[%s1257_s2 + $0xb0] sm:$0xff] }
   0x8   :  { %v331_v21 = vld [vmem:[%s1258_s3 + $0xa0] sm:$0xff]  ;;  %v332_v22 = vld [vmem:[%s1258_s3 + $0xa8] sm:$0xff]  ;;  %v110_v26 = vld [vmem:[%s1257_s2 + $0xb8] sm:$0xff] }
   0x9   :  { %v315_v23 = vld [vmem:[%s1258_s3 + $0x20] sm:$0xff]  ;;  %v316_v24 = vld [vmem:[%s1258_s3 + $0x28] sm:$0xff]  ;;  %v93_v27 = vld [vmem:[%s1257_s2 + $0x30] sm:$0xff] }
   0xa   :  { %425 = vperm.xlu0 %927, %v327_v5   ;;  %v94_v28 = vld [vmem:[%s1257_s2 + $0x38] sm:$0xff]  ;;  %v333_v29 = vld [vmem:[%s1258_s3 + $0xb0] sm:$0xff]  ;;  %v111_v33 = vld [vmem:[%s1257_s2 + $0xc0] sm:$0xff] }
   0xb   :  { %430 = vperm.xlu1 %928, %v328_v6   ;;  %v334_v30 = vld [vmem:[%s1258_s3 + $0xb8] sm:$0xff]  ;;  %v317_v31 = vld [vmem:[%s1258_s3 + $0x30] sm:$0xff]  ;;  %v112_v34 = vld [vmem:[%s1257_s2 + $0xc8] sm:$0xff] }
   0xc   :  { %v318_v32 = vld [vmem:[%s1258_s3 + $0x38] sm:$0xff]  ;;  %v95_v35 = vld [vmem:[%s1257_s2 + $0x40] sm:$0xff]  ;;  %v96_v36 = vld [vmem:[%s1257_s2 + $0x48] sm:$0xff] }
   0xd   :  { %v335_v37 = vld [vmem:[%s1258_s3 + $0xc0] sm:$0xff]  ;;  %v336_v38 = vld [vmem:[%s1258_s3 + $0xc8] sm:$0xff]  ;;  %v113_v41 = vld [vmem:[%s1257_s2 + $0xd0] sm:$0xff] }
   0xe   :  { %345 = vperm.xlu0 %927, %v311_v7   ;;  %v319_v39 = vld [vmem:[%s1258_s3 + $0x40] sm:$0xff]  ;;  %v320_v40 = vld [vmem:[%s1258_s3 + $0x48] sm:$0xff]  ;;  %v114_v42 = vld [vmem:[%s1257_s2 + $0xd8] sm:$0xff] }
   0xf   :  { %350 = vperm.xlu1 %928, %v312_v8   ;;  %v97_v43 = vld [vmem:[%s1257_s2 + $0x50] sm:$0xff]  ;;  %v98_v44 = vld [vmem:[%s1257_s2 + $0x58] sm:$0xff]  ;;  %v115_v49 = vld [vmem:[%s1257_s2 + $0xe0] sm:$0xff] }
  0x10   :  { %v337_v45 = vld [vmem:[%s1258_s3 + $0xd0] sm:$0xff]  ;;  %v338_v46 = vld [vmem:[%s1258_s3 + $0xd8] sm:$0xff]  ;;  %v116_v50 = vld [vmem:[%s1257_s2 + $0xe8] sm:$0xff] }
  0x11   :  { %v321_v47 = vld [vmem:[%s1258_s3 + $0x50] sm:$0xff]  ;;  %v322_v48 = vld [vmem:[%s1258_s3 + $0x58] sm:$0xff]  ;;  %v99_v51 = vld [vmem:[%s1257_s2 + $0x60] sm:$0xff] }
  0x12   :  { %211 = vperm.xlu0 %927, %v105_v9   ;;  %v100_v52 = vld [vmem:[%s1257_s2 + $0x68] sm:$0xff]  ;;  %v339_v53 = vld [vmem:[%s1258_s3 + $0xe0] sm:$0xff]  ;;  %v117_v57 = vld [vmem:[%s1257_s2 + $0xf0] sm:$0xff] }
  0x13   :  { %216 = vperm.xlu1 %928, %v106_v10   ;;  %v340_v54 = vld [vmem:[%s1258_s3 + $0xe8] sm:$0xff]  ;;  %v323_v55 = vld [vmem:[%s1258_s3 + $0x60] sm:$0xff]  ;;  %v118_v58 = vld [vmem:[%s1257_s2 + $0xf8] sm:$0xff] }
  0x14   :  { %v324_v56 = vld [vmem:[%s1258_s3 + $0x68] sm:$0xff]  ;;  %v101_v59 = vld [vmem:[%s1257_s2 + $0x70] sm:$0xff]  ;;  %v102_v60 = vld [vmem:[%s1257_s2 + $0x78] sm:$0xff] }
  0x15   :  { %v341_v61 = vld [vmem:[%s1258_s3 + $0xf0] sm:$0xff]  ;;  %v342_v62 = vld [vmem:[%s1258_s3 + $0xf8] sm:$0xff]  ;;  %v620_v1 = vld [vmem:[%s1259_s1 + $0x8] sm:$0xff] }
  0x16   :  { %131 = vperm.xlu0 %927, %v89_v11   ;;  %v325_v63 = vld [vmem:[%s1258_s3 + $0x70] sm:$0xff]  ;;  %v326_v0 = vld [vmem:[%s1258_s3 + $0x78] sm:$0xff]  ;;  %v619_v2 = vld [vmem:[%s1259_s1] sm:$0xff] }
  0x17   :  { %136 = vperm.xlu1 %928, %v90_v12   ;;  %v873_v3 = vld [vmem:[%s1260_s4 + $0x40] sm:$0xff]   ;;  %v622_v6 = vld [vmem:[%s1259_s1 + $0x18] sm:$0xff]  ;;  %v621_v7 = vld [vmem:[%s1259_s1 + $0x10] sm:$0xff] }
  0x18   :  { %v826_v8 = vunpack.c.l.bf16 %v873_v3  ;;  %v827_v9 = vunpack.c.h.bf16 %v873_v3  ;;  %v793_v10 = vld [vmem:[%s1260_s4] sm:$0xff]  }
  0x1a   :  { %435 = vperm.xlu0 %927, %v329_v13  }
  0x1b   :  { %440 = vperm.xlu1 %928, %v330_v14   ;;  %v794_v14 = vunpack.c.l.bf16 %v793_v10 }
  0x1e   :  { %355 = vperm.xlu0 %927, %v313_v15  }
  0x1f   :  { %360 = vperm.xlu1 %928, %v314_v16   ;;  %v795_v16 = vunpack.c.h.bf16 %v793_v10 }
  0x22   :  { %221 = vperm.xlu0 %927, %v107_v17   ;;  %v931_v17 = vld [vmem:[%s1261_s0 + $0x4] ss:$8 sps:$4 sm:$0xff]  }
  0x23   :  { %226 = vperm.xlu1 %928, %v108_v18   ;;  %695 = vmatprep.mubr.bf16.mxu0 %v931_v17 }
  0x26   :  { %141 = vperm.xlu0 %927, %v91_v19  }
  0x27   :  { %146 = vperm.xlu1 %928, %v92_v20   ;;  %v934_v20 = vld [vmem:[%s1261_s0 + $0x14] ss:$8 sps:$4 sm:$0xff]  }
  0x28   :  { %703 = vmatprep.mubr.bf16.mxu1 %v934_v20 }
  0x2a   :  { %445 = vperm.xlu0 %927, %v331_v21  }
  0x2b   :  { %450 = vperm.xlu1 %928, %v332_v22  }
  0x2e   :  { %365 = vperm.xlu0 %927, %v315_v23  }
  0x2f   :  { %370 = vperm.xlu1 %928, %v316_v24  }
  0x32   :  { %231 = vperm.xlu0 %927, %v109_v25  }
  0x33   :  { %236 = vperm.xlu1 %928, %v110_v26  }
  0x36   :  { %151 = vperm.xlu0 %927, %v93_v27  }
  0x37   :  { %156 = vperm.xlu1 %928, %v94_v28  }
  0x3a   :  { %455 = vperm.xlu0 %927, %v333_v29  }
  0x3b   :  { %460 = vperm.xlu1 %928, %v334_v30  }
  0x3e   :  { %375 = vperm.xlu0 %927, %v317_v31  }
  0x3f   :  { %380 = vperm.xlu1 %928, %v318_v32  }
  0x42   :  { %241 = vperm.xlu0 %927, %v111_v33  }
  0x43   :  { %246 = vperm.xlu1 %928, %v112_v34  }
  0x46   :  { %161 = vperm.xlu0 %927, %v95_v35  }
  0x47   :  { %166 = vperm.xlu1 %928, %v96_v36   ;;  %v874_v36 = vld [vmem:[%s1260_s4 + $0x48] sm:$0xff]  }
  0x4a   :  { %465 = vperm.xlu0 %927, %v335_v37  }
  0x4b   :  { %470 = vperm.xlu1 %928, %v336_v38  }
  0x4e   :  { %385 = vperm.xlu0 %927, %v319_v39  }
  0x4f   :  { %390 = vperm.xlu1 %928, %v320_v40  }
  0x52   :  { %251 = vperm.xlu0 %927, %v113_v41   ;;  %v830_v41 = vunpack.c.l.bf16 %v874_v36 }
  0x53   :  { %256 = vperm.xlu1 %928, %v114_v42   ;;  %v831_v42 = vunpack.c.h.bf16 %v874_v36  ;;  %v876_v36 = vld [vmem:[%s1260_s4 + $0x58] sm:$0xff]  }
  0x56   :  { %171 = vperm.xlu0 %927, %v97_v43  }
  0x57   :  { %176 = vperm.xlu1 %928, %v98_v44   ;;  %v866_v44 = vld [vmem:[%s1260_s4 + $0x8] sm:$0xff]  }
  0x5a   :  { %475 = vperm.xlu0 %927, %v337_v45  }
  0x5b   :  { %480 = vperm.xlu1 %928, %v338_v46  }
  0x5e   :  { %395 = vperm.xlu0 %927, %v321_v47  }
  0x5f   :  { %400 = vperm.xlu1 %928, %v322_v48  }
  0x62   :  { %261 = vperm.xlu0 %927, %v115_v49   ;;  %v798_v49 = vunpack.c.l.bf16 %v866_v44 }
  0x63   :  { %266 = vperm.xlu1 %928, %v116_v50   ;;  %v799_v50 = vunpack.c.h.bf16 %v866_v44  ;;  %v868_v44 = vld [vmem:[%s1260_s4 + $0x18] sm:$0xff]  }
  0x66   :  { %181 = vperm.xlu0 %927, %v99_v51  }
  0x67   :  { %186 = vperm.xlu1 %928, %v100_v52  }
  0x6a   :  { %485 = vperm.xlu0 %927, %v339_v53  }
  0x6b   :  { %490 = vperm.xlu1 %928, %v340_v54  }
  0x6e   :  { %405 = vperm.xlu0 %927, %v323_v55  }
  0x6f   :  { %410 = vperm.xlu1 %928, %v324_v56  }
  0x72   :  { %271 = vperm.xlu0 %927, %v117_v57  }
  0x73   :  { %276 = vperm.xlu1 %928, %v118_v58  }
  0x76   :  { %191 = vperm.xlu0 %927, %v101_v59  }
  0x77   :  { %196 = vperm.xlu1 %928, %v102_v60  }
  0x7a   :  { %495 = vperm.xlu0 %927, %v341_v61  }
  0x7b   :  { %500 = vperm.xlu1 %928, %v342_v62  }
  0x7e   :  { %415 = vperm.xlu0 %927, %v325_v63  }
  0x7f   :  { %420 = vperm.xlu1 %928, %v326_v0  }
  0x81   :  { %v202_v4 = vpop.permute.xlu0 %201 }
  0x82   :  { %v122_v5 = vpop.permute.xlu1 %121  ;;  %625 = vperm.xlu0 %927, %v619_v2   ;;  %v295_v13 = vmul.f32 %v826_v8, %v202_v4  ;;  %v875_v4 = vld [vmem:[%s1260_s4 + $0x50] sm:$0xff]  }
  0x83   :  { %630 = vperm.xlu1 %928, %v620_v1   ;;  %v279_v23 = vmul.f32 %v794_v14, %v122_v5  ;;  %v835_v10 = vunpack.c.h.bf16 %v875_v4 }
  0x85   :  { %v207_v11 = vpop.permute.xlu0 %206 }
  0x86   :  { %v127_v12 = vpop.permute.xlu1 %126  ;;  %635 = vperm.xlu0 %927, %v621_v7   ;;  %v296_v15 = vmul.f32 %v827_v9, %v207_v11  ;;  %v834_v9 = vunpack.c.l.bf16 %v875_v4  ;;  %v877_v4 = vld [vmem:[%s1260_s4 + $0x60] sm:$0xff]  }
  0x87   :  { %640 = vperm.xlu1 %928, %v622_v6   ;;  %v280_v24 = vmul.f32 %v795_v16, %v127_v12  ;;  %v867_v12 = vld [vmem:[%s1260_s4 + $0x10] sm:$0xff]  }
  0x88   :  { %v802_v17 = vunpack.c.l.bf16 %v867_v12 }
  0x89   :  { %v426_v18 = vpop.permute.xlu0 %425 }
  0x8a   :  { %v431_v19 = vpop.permute.xlu1 %430  ;;  %v519_v21 = vadd.f32 %v426_v18, %v295_v13  ;;  %v803_v18 = vunpack.c.h.bf16 %v867_v12  ;;  %v869_v12 = vld [vmem:[%s1260_s4 + $0x20] sm:$0xff]  }
  0x8b   :  { %v520_v22 = vadd.f32 %v431_v19, %v296_v15 }
  0x8c   :  { %v551_v25 = vmul.f32 0.2, %v519_v21 }
  0x8d   :  { %v552_v26 = vmul.f32 0.2, %v520_v22  ;;  %v346_v27 = vpop.permute.xlu0 %345 }
  0x8e   :  { %v351_v28 = vpop.permute.xlu1 %350  ;;  %v583_v29 = vmax.f32 %v519_v21, %v551_v25  ;;  %v503_v31 = vadd.f32 %v346_v27, %v279_v23 }
  0x8f   :  { %v584_v30 = vmax.f32 %v520_v22, %v552_v26  ;;  %v504_v32 = vadd.f32 %v351_v28, %v280_v24 }
  0x90   :  { %v535_v33 = vmul.f32 0.2, %v503_v31 }
  0x91   :  { %v536_v34 = vmul.f32 0.2, %v504_v32  ;;  %v607_v35 = vpack.c.bf16 %v584_v30, %v583_v29  ;;  %v212_v37 = vpop.permute.xlu0 %211 }
  0x92   :  { %v217_v38 = vpop.permute.xlu1 %216  ;;  %v567_v39 = vmax.f32 %v503_v31, %v535_v33  ;;  %v297_v47 = vmul.f32 %v830_v41, %v212_v37  ;;  %v838_v41 = vunpack.c.l.bf16 %v876_v36 }
  0x93   :  { %v568_v40 = vmax.f32 %v504_v32, %v536_v34  ;;  %882 = vmatprep.subr.bf16.mxu0 %v607_v35  ;;  %910 = vmatprep.subr.bf16.mxu1 %v607_v35  ;;  %v298_v48 = vmul.f32 %v831_v42, %v217_v38  ;;  %v839_v42 = vunpack.c.h.bf16 %v876_v36  ;;  %v878_v36 = vld [vmem:[%s1260_s4 + $0x68] sm:$0xff]  }
  0x95   :  { %v599_v43 = vpack.c.bf16 %v568_v40, %v567_v39  ;;  %v132_v45 = vpop.permute.xlu0 %131 }
  0x96   :  { %v137_v46 = vpop.permute.xlu1 %136  ;;  %v281_v55 = vmul.f32 %v798_v49, %v132_v45  ;;  %v806_v49 = vunpack.c.l.bf16 %v868_v44 }
  0x97   :  { %883 = vmatpush3.bf16.msra.mxu0 %v599_v43  ;;  %918 = vmatpush3.bf16.msra.mxu1 %v599_v43  ;;  %v282_v56 = vmul.f32 %v799_v50, %v137_v46  ;;  %v807_v50 = vunpack.c.h.bf16 %v868_v44  ;;  %v870_v44 = vld [vmem:[%s1260_s4 + $0x28] sm:$0xff]  }
  0x99   :  { %v436_v51 = vpop.permute.xlu0 %435 }
  0x9a   :  { %v441_v52 = vpop.permute.xlu1 %440  ;;  %v521_v53 = vadd.f32 %v436_v51, %v297_v47 }
  0x9b   :  { %v522_v54 = vadd.f32 %v441_v52, %v298_v48 }
  0x9c   :  { %v553_v57 = vmul.f32 0.2, %v521_v53 }
  0x9d   :  { %v554_v58 = vmul.f32 0.2, %v522_v54  ;;  %v356_v59 = vpop.permute.xlu0 %355 }
  0x9e   :  { %v361_v60 = vpop.permute.xlu1 %360  ;;  %v585_v61 = vmax.f32 %v521_v53, %v553_v57  ;;  %v505_v63 = vadd.f32 %v356_v59, %v281_v55 }
  0x9f   :  { %v586_v62 = vmax.f32 %v522_v54, %v554_v58  ;;  %v506_v0 = vadd.f32 %v361_v60, %v282_v56 }
  0xa0   :  { %v537_v1 = vmul.f32 0.2, %v505_v63 }
  0xa1   :  { %v538_v2 = vmul.f32 0.2, %v506_v0  ;;  %v608_v3 = vpack.c.bf16 %v586_v62, %v585_v61  ;;  %v222_v5 = vpop.permute.xlu0 %221 }
  0xa2   :  { %v227_v6 = vpop.permute.xlu1 %226  ;;  %v569_v7 = vmax.f32 %v505_v63, %v537_v1  ;;  %v299_v15 = vmul.f32 %v834_v9, %v222_v5  ;;  %v842_v9 = vunpack.c.l.bf16 %v877_v4 }
  0xa3   :  { %v570_v8 = vmax.f32 %v506_v0, %v538_v2  ;;  %884 = vmatprep.subr.bf16.mxu0 %v608_v3  ;;  %911 = vmatprep.subr.bf16.mxu1 %v608_v3  ;;  %v300_v16 = vmul.f32 %v835_v10, %v227_v6  ;;  %v843_v10 = vunpack.c.h.bf16 %v877_v4  ;;  %v879_v4 = vld [vmem:[%s1260_s4 + $0x70] sm:$0xff]  }
  0xa5   :  { %v600_v11 = vpack.c.bf16 %v570_v8, %v569_v7  ;;  %v142_v13 = vpop.permute.xlu0 %141 }
  0xa6   :  { %v147_v14 = vpop.permute.xlu1 %146  ;;  %v283_v23 = vmul.f32 %v802_v17, %v142_v13  ;;  %v810_v17 = vunpack.c.l.bf16 %v869_v12 }
  0xa7   :  { %885 = vmatpush3.bf16.msra.mxu0 %v600_v11  ;;  %919 = vmatpush3.bf16.msra.mxu1 %v600_v11  ;;  %v284_v24 = vmul.f32 %v803_v18, %v147_v14  ;;  %v811_v18 = vunpack.c.h.bf16 %v869_v12  ;;  %v871_v12 = vld [vmem:[%s1260_s4 + $0x30] sm:$0xff]  }
  0xa9   :  { %v446_v19 = vpop.permute.xlu0 %445 }
  0xaa   :  { %v451_v20 = vpop.permute.xlu1 %450  ;;  %v523_v21 = vadd.f32 %v446_v19, %v299_v15 }
  0xab   :  { %v524_v22 = vadd.f32 %v451_v20, %v300_v16 }
  0xac   :  { %v555_v25 = vmul.f32 0.2, %v523_v21 }
  0xad   :  { %v556_v26 = vmul.f32 0.2, %v524_v22  ;;  %v366_v27 = vpop.permute.xlu0 %365 }
  0xae   :  { %v371_v28 = vpop.permute.xlu1 %370  ;;  %v587_v29 = vmax.f32 %v523_v21, %v555_v25  ;;  %v507_v31 = vadd.f32 %v366_v27, %v283_v23 }
  0xaf   :  { %v588_v30 = vmax.f32 %v524_v22, %v556_v26  ;;  %v508_v32 = vadd.f32 %v371_v28, %v284_v24 }
  0xb0   :  { %v539_v33 = vmul.f32 0.2, %v507_v31 }
  0xb1   :  { %v540_v34 = vmul.f32 0.2, %v508_v32  ;;  %v609_v35 = vpack.c.bf16 %v588_v30, %v587_v29  ;;  %v232_v37 = vpop.permute.xlu0 %231 }
  0xb2   :  { %v237_v38 = vpop.permute.xlu1 %236  ;;  %v571_v39 = vmax.f32 %v507_v31, %v539_v33  ;;  %v301_v47 = vmul.f32 %v838_v41, %v232_v37  ;;  %v846_v41 = vunpack.c.l.bf16 %v878_v36 }
  0xb3   :  { %v572_v40 = vmax.f32 %v508_v32, %v540_v34  ;;  %886 = vmatprep.subr.bf16.mxu0 %v609_v35  ;;  %912 = vmatprep.subr.bf16.mxu1 %v609_v35  ;;  %v302_v48 = vmul.f32 %v839_v42, %v237_v38  ;;  %v847_v42 = vunpack.c.h.bf16 %v878_v36  ;;  %v880_v36 = vld [vmem:[%s1260_s4 + $0x78] sm:$0xff]  }
  0xb5   :  { %v601_v43 = vpack.c.bf16 %v572_v40, %v571_v39  ;;  %v152_v45 = vpop.permute.xlu0 %151 }
  0xb6   :  { %v157_v46 = vpop.permute.xlu1 %156  ;;  %v285_v55 = vmul.f32 %v806_v49, %v152_v45  ;;  %v814_v49 = vunpack.c.l.bf16 %v870_v44 }
  0xb7   :  { %887 = vmatpush3.bf16.msra.mxu0 %v601_v43  ;;  %920 = vmatpush3.bf16.msra.mxu1 %v601_v43  ;;  %v286_v56 = vmul.f32 %v807_v50, %v157_v46  ;;  %v815_v50 = vunpack.c.h.bf16 %v870_v44  ;;  %v872_v44 = vld [vmem:[%s1260_s4 + $0x38] sm:$0xff]  }
  0xb9   :  { %v456_v51 = vpop.permute.xlu0 %455 }
  0xba   :  { %v461_v52 = vpop.permute.xlu1 %460  ;;  %v525_v53 = vadd.f32 %v456_v51, %v301_v47 }
  0xbb   :  { %v526_v54 = vadd.f32 %v461_v52, %v302_v48 }
  0xbc   :  { %v557_v57 = vmul.f32 0.2, %v525_v53 }
  0xbd   :  { %v558_v58 = vmul.f32 0.2, %v526_v54  ;;  %v376_v59 = vpop.permute.xlu0 %375 }
  0xbe   :  { %v381_v60 = vpop.permute.xlu1 %380  ;;  %v589_v61 = vmax.f32 %v525_v53, %v557_v57  ;;  %v509_v63 = vadd.f32 %v376_v59, %v285_v55 }
  0xbf   :  { %v590_v62 = vmax.f32 %v526_v54, %v558_v58  ;;  %v510_v0 = vadd.f32 %v381_v60, %v286_v56 }
  0xc0   :  { %v541_v1 = vmul.f32 0.2, %v509_v63 }
  0xc1   :  { %v542_v2 = vmul.f32 0.2, %v510_v0  ;;  %v610_v3 = vpack.c.bf16 %v590_v62, %v589_v61  ;;  %v242_v5 = vpop.permute.xlu0 %241 }
  0xc2   :  { %v247_v6 = vpop.permute.xlu1 %246  ;;  %v573_v7 = vmax.f32 %v509_v63, %v541_v1  ;;  %v303_v15 = vmul.f32 %v842_v9, %v242_v5  ;;  %v850_v9 = vunpack.c.l.bf16 %v879_v4 }
  0xc3   :  { %v574_v8 = vmax.f32 %v510_v0, %v542_v2  ;;  %888 = vmatprep.subr.bf16.mxu0 %v610_v3  ;;  %913 = vmatprep.subr.bf16.mxu1 %v610_v3  ;;  %v304_v16 = vmul.f32 %v843_v10, %v247_v6  ;;  %v851_v10 = vunpack.c.h.bf16 %v879_v4 }
  0xc5   :  { %v602_v11 = vpack.c.bf16 %v574_v8, %v573_v7  ;;  %v162_v13 = vpop.permute.xlu0 %161 }
  0xc6   :  { %v167_v14 = vpop.permute.xlu1 %166  ;;  %v287_v23 = vmul.f32 %v810_v17, %v162_v13  ;;  %v818_v17 = vunpack.c.l.bf16 %v871_v12 }
  0xc7   :  { %889 = vmatpush3.bf16.msra.mxu0 %v602_v11  ;;  %921 = vmatpush3.bf16.msra.mxu1 %v602_v11  ;;  %v288_v24 = vmul.f32 %v811_v18, %v167_v14  ;;  %v819_v18 = vunpack.c.h.bf16 %v871_v12 }
  0xc9   :  { %v466_v19 = vpop.permute.xlu0 %465 }
  0xca   :  { %v471_v20 = vpop.permute.xlu1 %470  ;;  %v527_v21 = vadd.f32 %v466_v19, %v303_v15 }
  0xcb   :  { %v528_v22 = vadd.f32 %v471_v20, %v304_v16 }
  0xcc   :  { %v559_v25 = vmul.f32 0.2, %v527_v21 }
  0xcd   :  { %v560_v26 = vmul.f32 0.2, %v528_v22  ;;  %v386_v27 = vpop.permute.xlu0 %385 }
  0xce   :  { %v391_v28 = vpop.permute.xlu1 %390  ;;  %v591_v29 = vmax.f32 %v527_v21, %v559_v25  ;;  %v511_v31 = vadd.f32 %v386_v27, %v287_v23 }
  0xcf   :  { %v592_v30 = vmax.f32 %v528_v22, %v560_v26  ;;  %v512_v32 = vadd.f32 %v391_v28, %v288_v24 }
  0xd0   :  { %v543_v33 = vmul.f32 0.2, %v511_v31 }
  0xd1   :  { %v544_v34 = vmul.f32 0.2, %v512_v32  ;;  %v611_v35 = vpack.c.bf16 %v592_v30, %v591_v29  ;;  %v252_v37 = vpop.permute.xlu0 %251 }
  0xd2   :  { %v257_v38 = vpop.permute.xlu1 %256  ;;  %v575_v39 = vmax.f32 %v511_v31, %v543_v33  ;;  %v305_v47 = vmul.f32 %v846_v41, %v252_v37  ;;  %v854_v41 = vunpack.c.l.bf16 %v880_v36 }
  0xd3   :  { %v576_v40 = vmax.f32 %v512_v32, %v544_v34  ;;  %890 = vmatprep.subr.bf16.mxu0 %v611_v35  ;;  %914 = vmatprep.subr.bf16.mxu1 %v611_v35  ;;  %v306_v48 = vmul.f32 %v847_v42, %v257_v38  ;;  %v855_v42 = vunpack.c.h.bf16 %v880_v36 }
  0xd5   :  { %v603_v43 = vpack.c.bf16 %v576_v40, %v575_v39  ;;  %v172_v45 = vpop.permute.xlu0 %171 }
  0xd6   :  { %v177_v46 = vpop.permute.xlu1 %176  ;;  %v289_v55 = vmul.f32 %v814_v49, %v172_v45  ;;  %v822_v49 = vunpack.c.l.bf16 %v872_v44 }
  0xd7   :  { %891 = vmatpush3.bf16.msra.mxu0 %v603_v43  ;;  %922 = vmatpush3.bf16.msra.mxu1 %v603_v43  ;;  %v290_v56 = vmul.f32 %v815_v50, %v177_v46  ;;  %v823_v50 = vunpack.c.h.bf16 %v872_v44 }
  0xd9   :  { %v476_v51 = vpop.permute.xlu0 %475 }
  0xda   :  { %v481_v52 = vpop.permute.xlu1 %480  ;;  %v529_v53 = vadd.f32 %v476_v51, %v305_v47 }
  0xdb   :  { %v530_v54 = vadd.f32 %v481_v52, %v306_v48 }
  0xdc   :  { %v561_v57 = vmul.f32 0.2, %v529_v53 }
  0xdd   :  { %v562_v58 = vmul.f32 0.2, %v530_v54  ;;  %v396_v59 = vpop.permute.xlu0 %395 }
  0xde   :  { %v401_v60 = vpop.permute.xlu1 %400  ;;  %v593_v61 = vmax.f32 %v529_v53, %v561_v57  ;;  %v513_v63 = vadd.f32 %v396_v59, %v289_v55 }
  0xdf   :  { %v594_v62 = vmax.f32 %v530_v54, %v562_v58  ;;  %v514_v0 = vadd.f32 %v401_v60, %v290_v56 }
  0xe0   :  { %v545_v1 = vmul.f32 0.2, %v513_v63 }
  0xe1   :  { %v546_v2 = vmul.f32 0.2, %v514_v0  ;;  %v612_v3 = vpack.c.bf16 %v594_v62, %v593_v61  ;;  %v262_v5 = vpop.permute.xlu0 %261 }
  0xe2   :  { %v267_v6 = vpop.permute.xlu1 %266  ;;  %v577_v7 = vmax.f32 %v513_v63, %v545_v1  ;;  %v307_v15 = vmul.f32 %v850_v9, %v262_v5  ;;  %v713_v9 = vlaneseq }
  0xe3   :  { %v578_v8 = vmax.f32 %v514_v0, %v546_v2  ;;  %892 = vmatprep.subr.bf16.mxu0 %v612_v3  ;;  %915 = vmatprep.subr.bf16.mxu1 %v612_v3  ;;  %v308_v16 = vmul.f32 %v851_v10, %v267_v6 }
  0xe4   :  { %v714_v12 = vand.u32 127, %v713_v9 }
  0xe5   :  { %v604_v11 = vpack.c.bf16 %v578_v8, %v577_v7  ;;  %v182_v13 = vpop.permute.xlu0 %181  ;;  %v929_v7 = vld [vmem:[%s1261_s0] ss:$8 sps:$4 sm:$0xff]   ;;  %v932_v8 = vld [vmem:[%s1261_s0 + $0x10] ss:$8 sps:$4 sm:$0xff]  }
  0xe6   :  { %v187_v14 = vpop.permute.xlu1 %186  ;;  %v291_v23 = vmul.f32 %v818_v17, %v182_v13  ;;  %vm717_vm0 = vcmp.lt.s32.totalorder %v714_v12, 32  ;;  %vm742_vm1 = vcmp.eq.s32.totalorder %v714_v12, 0 }
  0xe7   :  { %893 = vmatpush3.bf16.msra.mxu0 %v604_v11  ;;  %923 = vmatpush3.bf16.msra.mxu1 %v604_v11  ;;  %v292_v24 = vmul.f32 %v819_v18, %v187_v14 }
  0xe9   :  { %v486_v19 = vpop.permute.xlu0 %485 }
  0xea   :  { %v491_v20 = vpop.permute.xlu1 %490  ;;  %v531_v21 = vadd.f32 %v486_v19, %v307_v15 }
  0xeb   :  { %v532_v22 = vadd.f32 %v491_v20, %v308_v16 }
  0xec   :  { %v563_v25 = vmul.f32 0.2, %v531_v21 }
  0xed   :  { %v564_v26 = vmul.f32 0.2, %v532_v22  ;;  %v406_v27 = vpop.permute.xlu0 %405 }
  0xee   :  { %v411_v28 = vpop.permute.xlu1 %410  ;;  %v595_v29 = vmax.f32 %v531_v21, %v563_v25  ;;  %v515_v31 = vadd.f32 %v406_v27, %v291_v23 }
  0xef   :  { %v596_v30 = vmax.f32 %v532_v22, %v564_v26  ;;  %v516_v32 = vadd.f32 %v411_v28, %v292_v24 }
  0xf0   :  { %v547_v33 = vmul.f32 0.2, %v515_v31 }
  0xf1   :  { %v548_v34 = vmul.f32 0.2, %v516_v32  ;;  %v613_v35 = vpack.c.bf16 %v596_v30, %v595_v29  ;;  %v272_v37 = vpop.permute.xlu0 %271 }
  0xf2   :  { %v277_v38 = vpop.permute.xlu1 %276  ;;  %v579_v39 = vmax.f32 %v515_v31, %v547_v33  ;;  %v309_v47 = vmul.f32 %v854_v41, %v272_v37 }
  0xf3   :  { %v580_v40 = vmax.f32 %v516_v32, %v548_v34  ;;  %894 = vmatprep.subr.bf16.mxu0 %v613_v35  ;;  %916 = vmatprep.subr.bf16.mxu1 %v613_v35  ;;  %v310_v48 = vmul.f32 %v855_v42, %v277_v38 }
  0xf5   :  { %v605_v43 = vpack.c.bf16 %v580_v40, %v579_v39  ;;  %v192_v45 = vpop.permute.xlu0 %191 }
  0xf6   :  { %v197_v46 = vpop.permute.xlu1 %196  ;;  %v293_v55 = vmul.f32 %v822_v49, %v192_v45 }
  0xf7   :  { %895 = vmatpush3.bf16.msra.mxu0 %v605_v43  ;;  %924 = vmatpush3.bf16.msra.mxu1 %v605_v43  ;;  %v294_v56 = vmul.f32 %v823_v50, %v197_v46 }
  0xf9   :  { %v496_v51 = vpop.permute.xlu0 %495 }
  0xfa   :  { %v501_v52 = vpop.permute.xlu1 %500  ;;  %v533_v53 = vadd.f32 %v496_v51, %v309_v47 }
  0xfb   :  { %v534_v54 = vadd.f32 %v501_v52, %v310_v48 }
  0xfc   :  { %v565_v57 = vmul.f32 0.2, %v533_v53 }
  0xfd   :  { %v566_v58 = vmul.f32 0.2, %v534_v54  ;;  %v416_v59 = vpop.permute.xlu0 %415 }
  0xfe   :  { %v421_v60 = vpop.permute.xlu1 %420  ;;  %v597_v61 = vmax.f32 %v533_v53, %v565_v57  ;;  %v517_v63 = vadd.f32 %v416_v59, %v293_v55 }
  0xff   :  { %v598_v62 = vmax.f32 %v534_v54, %v566_v58  ;;  %v518_v0 = vadd.f32 %v421_v60, %v294_v56 }
 0x100   :  { %v549_v1 = vmul.f32 0.2, %v517_v63 }
 0x101   :  { %v550_v2 = vmul.f32 0.2, %v518_v0  ;;  %v614_v3 = vpack.c.bf16 %v598_v62, %v597_v61  ;;  %v626_v11 = vpop.permute.xlu0 %625 }
 0x102   :  { %v581_v4 = vmax.f32 %v517_v63, %v549_v1  ;;  %v631_v10 = vpop.permute.xlu1 %630 }
 0x103   :  { %v582_v5 = vmax.f32 %v518_v0, %v550_v2  ;;  %896 = vmatprep.subr.bf16.mxu0 %v614_v3  ;;  %917 = vmatprep.subr.bf16.mxu1 %v614_v3 }
 0x105   :  { %v606_v6 = vpack.c.bf16 %v582_v5, %v581_v4  ;;  %v636_v27 = vpop.permute.xlu0 %635 }
 0x106   :  { %v641_v26 = vpop.permute.xlu1 %640 }
 0x107   :  { %897 = vmatpush3.bf16.msra.mxu0 %v606_v6  ;;  %925 = vmatpush3.bf16.msra.mxu1 %v606_v6 }
 0x10a   :  { %696 = vmatmul.mubr.bf16.vlgmr.msra.gmra.mrb[0].mxu0 %v929_v7  ;;  %704 = vmatmul.mubr.bf16.vlgmr.msra.gmra.mrb[0].mxu1 %v932_v8 }
 0x1dd   :  { %v898_v13 = vpop.f32.mrb[0].mxu0  ;;  %v904_v14 = vpop.f32.mrb[0].mxu1 }
 0x1de   :  { %v899_v15 = vpop.f32.mrb[1].mxu0  ;;  %v905_v16 = vpop.f32.mrb[1].mxu1 }
 0x1df   :  { %v900_v17 = vadd.f32 %v899_v15, %v898_v13  ;;  %v906_v18 = vadd.f32 %v905_v16, %v904_v14  ;;  %v901_v19 = vpop.f32.mrb[2].mxu0  ;;  %v907_v20 = vpop.f32.mrb[2].mxu1 }
 0x1e0   :  { %v902_v21 = vpop.f32.mrb[3].mxu0  ;;  %v908_v22 = vpop.f32.mrb[3].mxu1 }
 0x1e1   :  { %v903_v23 = vadd.f32 %v902_v21, %v901_v19  ;;  %v909_v24 = vadd.f32 %v908_v22, %v907_v20  ;;  %v698_v25 = vadd.f32 %v900_v17, %v626_v11  ;;  %v706_v30 = vadd.f32 %v906_v18, %v636_v27 }
 0x1e3   :  { %v718_v28 = vsel %vm717_vm0, %v698_v25, 0.0  ;;  %v701_v29 = vadd.f32 %v903_v23, %v631_v10  ;;  %v709_v31 = vadd.f32 %v909_v24, %v641_v26  ;;  %v720_v35 = vsel %vm717_vm0, %v706_v30, 0.0 }
 0x1e4   :  { %722 = vadd.xlane.f32.xlu0 %v718_v28  ;;  %v730_v36 = vmul.f32 %v718_v28, %v718_v28  ;;  %v732_v38 = vmul.f32 %v720_v35, %v720_v35 }
 0x1e5   :  { %v719_v32 = vsel %vm717_vm0, %v701_v29, 0.0  ;;  %v859_v33 = vpack.c.bf16 %v701_v29, %v698_v25  ;;  %v864_v34 = vpack.c.bf16 %v709_v31, %v706_v30  ;;  %v721_v37 = vsel %vm717_vm0, %v709_v31, 0.0 }
 0x1e6   :  { %724 = vadd.xlane.f32.xlu1 %v719_v32  ;;  %v731_v39 = vmul.f32 %v719_v32, %v719_v32  ;;  %v733_v40 = vmul.f32 %v721_v37, %v721_v37 }
 0x1e7   :  { %860 = vst [vmem:[%s1262_s5] sm:$0xff] %v859_v33   ;;  %881 = vst [vmem:[%s1262_s5 + $0x8] sm:$0xff] %v864_v34  }
 0x1e8   :  { %726 = vadd.xlane.f32.xlu0 %v720_v35 }
 0x1ea   :  { %734 = vadd.xlane.f32.xlu1 %v730_v36 }
 0x1ec   :  { %728 = vadd.xlane.f32.xlu0 %v721_v37 }
 0x1ee   :  { %738 = vadd.xlane.f32.xlu1 %v732_v38 }
 0x1f0   :  { %736 = vadd.xlane.f32.xlu0 %v731_v39 }
 0x1f4   :  { %740 = vadd.xlane.f32.xlu0 %v733_v40 }
 0x271   :  { %v723_v41 = vpop.xlane.xlu0 %722 }
 0x273   :  { %v725_v42 = vpop.xlane.xlu1 %724 }
 0x275   :  { %v727_v43 = vpop.xlane.xlu0 %726 }
 0x277   :  { %v735_v44 = vpop.xlane.xlu1 %734 }
 0x278   :  { %v743_v45 = vsel %vm742_vm1, %v723_v41, %v735_v44 }
 0x279   :  { %748 = vst.msk [vmem:[%s1263_s6] sm:$0xff] %vm747_vm2, %v743_v45  ;;  %v729_v46 = vpop.xlane.xlu0 %728 }
 0x27b   :  { %v739_v47 = vpop.xlane.xlu1 %738 }
 0x27c   :  { %v745_v48 = vsel %vm742_vm1, %v727_v43, %v739_v47 }
 0x27d   :  { %750 = vst.msk [vmem:[%s1263_s6 + $0x10] sm:$0xff] %vm747_vm2, %v745_v48  ;;  %v737_v49 = vpop.xlane.xlu0 %736 }
 0x27e   :  { %v744_v50 = vsel %vm742_vm1, %v725_v42, %v737_v49 }
 0x27f   :  { %749 = vst.msk [vmem:[%s1263_s6 + $0x8] sm:$0xff] %vm747_vm2, %v744_v50 }
 0x281   :  { %v741_v51 = vpop.xlane.xlu0 %740 }
 0x282   :  { %v746_v52 = vsel %vm742_vm1, %v729_v46, %v741_v51 }
 0x283   :  { %751 = vst.msk [vmem:[%s1263_s6 + $0x18] sm:$0xff] %vm747_vm2, %v746_v52 }

</bundles_post_ra>
